<compile_context>
chip_gen: v5e
topology: v5e:2x2
jax: 0.10.0
libtpu: 0.0.40
codegen_flags: <defaults>
</compile_context>

<pallas_src>
import math

import jax
import jax.numpy as jnp
from jax.experimental import pallas as pl
from jax.experimental.pallas import tpu as pltpu

# ----------------------------- model config ---------------------------------
VOCAB_SIZE = 50
D_MODEL    = 128
NUM_HEADS  = 4
D_FF       = 256
NUM_LAYERS = 2
HEAD_DIM   = D_MODEL // NUM_HEADS
LN_EPS     = 1e-5
NEG_INF    = -1e9
HEAD_PAD   = 128          # lane-dense padded width of the QA-head output

BATCH = 2
SEQ   = 8


# --------------------------- in-kernel helpers -------------------------------
def _layer_norm(x, gamma, beta):
    mu = jnp.mean(x, axis=-1, keepdims=True)
    var = jnp.mean((x - mu) ** 2, axis=-1, keepdims=True)
    return (x - mu) * jax.lax.rsqrt(var + LN_EPS) * gamma + beta


def _mm(a, b):
    return jnp.dot(a, b, preferred_element_type=jnp.float32)


# --------------------------- fused model kernel ------------------------------
def bert_fused_kernel(x_ref, mask_ref,
                      wqkv_ref, bqkv_ref, wo_ref, bo_ref,
                      g1_ref, be1_ref, w1_ref, b1_ref,
                      w2_ref, b2_ref, g2_ref, be2_ref,
                      whead_ref, bhead_ref,
                      out_ref):
    x = x_ref[...]            # (B*S, D) activation slab
    mask2d = mask_ref[...]    # (B*S, B*S): 1.0 = attendable key (same batch, non-pad)
    scale = 1.0 / math.sqrt(HEAD_DIM)

    for li in range(NUM_LAYERS):                 # unrolled (NUM_LAYERS = 2)
        # --- fused QKV projection: one (B*S,128) @ (128,384) matmul ---
        qkv = _mm(x, wqkv_ref[li]) + bqkv_ref[li]
        q = qkv[:, 0:D_MODEL]                    # vreg-aligned 128-lane slices
        k = qkv[:, D_MODEL:2 * D_MODEL]
        v = qkv[:, 2 * D_MODEL:3 * D_MODEL]

        wo_l = wo_ref[li]                        # (D, D)
        attn = jnp.zeros(x.shape, jnp.float32)   # per-head accumulation target
        for h in range(NUM_HEADS):               # unrolled (4 heads)
            lo, hi = h * HEAD_DIM, (h + 1) * HEAD_DIM
            qh, kh, vh = q[:, lo:hi], k[:, lo:hi], v[:, lo:hi]
            # scores[i, j] = qh[i] . kh[j]   (block-diagonal across batches)
            s = jax.lax.dot_general(qh, kh, (((1,), (1,)), ((), ())),
                                    preferred_element_type=jnp.float32) * scale
            s = jnp.where(mask2d > 0.0, s, NEG_INF)
            s = s - jnp.max(s, axis=-1, keepdims=True)
            p = jnp.exp(s)
            p = p * pl.reciprocal(jnp.sum(p, axis=-1, keepdims=True), approx=True)
            ctx = _mm(p, vh)                     # (B*S, HEAD_DIM)
            # accumulate this head's slice of the output projection -> no concat
            attn = attn + _mm(ctx, wo_l[lo:hi, :])
        attn = attn + bo_ref[li]

        # --- add & norm, feed-forward (ReLU), add & norm ---
        x = _layer_norm(x + attn, g1_ref[li], be1_ref[li])
        h1 = jnp.maximum(_mm(x, w1_ref[li]) + b1_ref[li], 0.0)
        ff = _mm(h1, w2_ref[li]) + b2_ref[li]
        x = _layer_norm(x + ff, g2_ref[li], be2_ref[li])

    # --- QA heads, padded to a lane-dense 128-wide output ---
    # col 0 = start logit, col 1 = end logit, col 2 = answerable logit, rest 0.
    out_ref[...] = _mm(x, whead_ref[...]) + bhead_ref[...]


def bert_qa_pallas(x_slab, mask2d, enc):
    """x_slab: (B*S, D) f32; mask2d: (B*S, B*S) f32; enc: stacked weights."""
    args = [x_slab, mask2d,
            enc["wqkv"], enc["bqkv"], enc["wo"], enc["bo"],
            enc["g1"], enc["be1"], enc["w1"], enc["b1"],
            enc["w2"], enc["b2"], enc["g2"], enc["be2"],
            enc["whead"], enc["bhead"]]
    return pl.pallas_call(
        bert_fused_kernel,
        out_shape=jax.ShapeDtypeStruct((x_slab.shape[0], HEAD_PAD), jnp.float32),
        compiler_params=pltpu.CompilerParams(vmem_limit_bytes=32 * 1024 * 1024),
    )(*args)


# ------------------------------ parameter init --------------------------------
def init_params(key):
    k_emb, k_layers, k_heads = jax.random.split(key, 3)

    def dense(k, fan_in, fan_out):
        w = jax.random.normal(k, (fan_in, fan_out), jnp.float32) * 0.02
        b = jnp.zeros((fan_out,), jnp.float32)
        return w, b

    params = {"embedding": jax.random.normal(
        k_emb, (VOCAB_SIZE, D_MODEL), jnp.float32) * 0.02}

    layer_keys = jax.random.split(k_layers, NUM_LAYERS)
    acc = {name: [] for name in
           ["wqkv", "bqkv", "wo", "bo", "g1", "be1",
            "w1", "b1", "w2", "b2", "g2", "be2"]}
    for li in range(NUM_LAYERS):
        lk = jax.random.split(layer_keys[li], 6)
        wq, bq = dense(lk[0], D_MODEL, D_MODEL)
        wk, bk = dense(lk[1], D_MODEL, D_MODEL)
        wv, bv = dense(lk[2], D_MODEL, D_MODEL)
        wo, bo = dense(lk[3], D_MODEL, D_MODEL)
        w1, b1 = dense(lk[4], D_MODEL, D_FF)
        w2, b2 = dense(lk[5], D_FF, D_MODEL)
        acc["wqkv"].append(jnp.concatenate([wq, wk, wv], axis=1))      # (D, 3D)
        acc["bqkv"].append(jnp.concatenate([bq, bk, bv])[None, :])     # (1, 3D)
        acc["wo"].append(wo)
        acc["bo"].append(bo[None, :])
        acc["g1"].append(jnp.ones((1, D_MODEL), jnp.float32))
        acc["be1"].append(jnp.zeros((1, D_MODEL), jnp.float32))
        acc["w1"].append(w1)
        acc["b1"].append(b1[None, :])
        acc["w2"].append(w2)
        acc["b2"].append(b2[None, :])
        acc["g2"].append(jnp.ones((1, D_MODEL), jnp.float32))
        acc["be2"].append(jnp.zeros((1, D_MODEL), jnp.float32))

    encoder = {name: jnp.stack(vals, axis=0) for name, vals in acc.items()}

    hk = jax.random.split(k_heads, 2)
    wqa, bqa = dense(hk[0], D_MODEL, 2)      # qa_outputs: start/end logits
    wcls, bcls = dense(hk[1], D_MODEL, 1)    # qa_classifier: answerable logit
    whead = jnp.zeros((D_MODEL, HEAD_PAD), jnp.float32)
    whead = whead.at[:, 0:2].set(wqa).at[:, 2:3].set(wcls)
    bhead = jnp.zeros((1, HEAD_PAD), jnp.float32)
    bhead = bhead.at[0, 0:2].set(bqa).at[0, 2].set(bcls[0])
    encoder["whead"] = whead
    encoder["bhead"] = bhead

    params["encoder"] = encoder
    return params


def sinusoidal_pe(seq_len, d_model):
    pos = jnp.arange(seq_len, dtype=jnp.float32)[:, None]
    div = jnp.exp(jnp.arange(0, d_model, 2, dtype=jnp.float32)
                  * (-math.log(10000.0) / d_model))
    pe = jnp.zeros((seq_len, d_model), jnp.float32)
    pe = pe.at[:, 0::2].set(jnp.sin(pos * div))
    pe = pe.at[:, 1::2].set(jnp.cos(pos * div))
    return pe


# ------------------------------ forward pass ---------------------------------
@jax.jit
def bert_qa_forward(params, input_ids):
    B, S = input_ids.shape
    attention_mask = (input_ids != 0).astype(jnp.float32)          # (B, S)

    # Batch folded into one slab: key mask is block-diagonal over batches and
    # zero on padded keys (equivalent to per-batch key-padding masking).
    key_valid = attention_mask.reshape(B * S)                      # (B*S,)
    batch_id = jnp.repeat(jnp.arange(B), S)                        # (B*S,)
    same_batch = (batch_id[:, None] == batch_id[None, :]).astype(jnp.float32)
    mask2d = same_batch * key_valid[None, :]                       # (B*S, B*S)

    # glue: embedding lookup + positional encoding (dropout is eval-mode identity)
    x = params["embedding"][input_ids] * math.sqrt(D_MODEL)        # (B, S, D)
    x = x + sinusoidal_pe(S, D_MODEL)[None, :, :]
    x_slab = x.reshape(B * S, D_MODEL)
    # TODO(synk): dropout (rate=0.1) is a no-op here (eval mode); no RNG dropout applied.

    head_out = bert_qa_pallas(x_slab, mask2d, params["encoder"])   # (B*S, 128)
    head_out = head_out.reshape(B, S, HEAD_PAD)

    start_logits = head_out[:, :, 0]          # (B, S)
    end_logits = head_out[:, :, 1]            # (B, S)
    answerable_logits = head_out[:, 0, 2]     # (B,)  -- CLS-token projection
    return start_logits, end_logits, answerable_logits


# ----------------------------------- main -------------------------------------
if __name__ == "__main__":
    key = jax.random.PRNGKey(0)
    pkey, dkey = jax.random.split(key)

    params = init_params(pkey)

    # deterministic example input: tokens in [1, VOCAB) with some padding (0)
    input_ids = jax.random.randint(dkey, (BATCH, SEQ), 1, VOCAB_SIZE,
                                   dtype=jnp.int32)
    input_ids = input_ids.at[1, -2:].set(0)   # pad last two tokens of batch 1

    start_logits, end_logits, answerable_logits = bert_qa_forward(
        params, input_ids)
    jax.block_until_ready((start_logits, end_logits, answerable_logits))

    assert start_logits.shape == (BATCH, SEQ)
    assert end_logits.shape == (BATCH, SEQ)
    assert answerable_logits.shape == (BATCH,)
    print("KERNEL_OK")
</pallas_src>

<mosaic_0001>
module attributes {stable_mosaic.version = 11 : i64} {
  func.func @bert_fused_kernel(%arg0: memref<16x128xf32, #tpu.memory_space<vmem>>, %arg1: memref<16x16xf32, #tpu.memory_space<vmem>>, %arg2: memref<2x128x384xf32, #tpu.memory_space<vmem>>, %arg3: memref<2x1x384xf32, #tpu.memory_space<vmem>>, %arg4: memref<2x128x128xf32, #tpu.memory_space<vmem>>, %arg5: memref<2x1x128xf32, #tpu.memory_space<vmem>>, %arg6: memref<2x1x128xf32, #tpu.memory_space<vmem>>, %arg7: memref<2x1x128xf32, #tpu.memory_space<vmem>>, %arg8: memref<2x128x256xf32, #tpu.memory_space<vmem>>, %arg9: memref<2x1x256xf32, #tpu.memory_space<vmem>>, %arg10: memref<2x256x128xf32, #tpu.memory_space<vmem>>, %arg11: memref<2x1x128xf32, #tpu.memory_space<vmem>>, %arg12: memref<2x1x128xf32, #tpu.memory_space<vmem>>, %arg13: memref<2x1x128xf32, #tpu.memory_space<vmem>>, %arg14: memref<128x128xf32, #tpu.memory_space<vmem>>, %arg15: memref<1x128xf32, #tpu.memory_space<vmem>>, %arg16: memref<16x128xf32, #tpu.memory_space<vmem>>) attributes {dimension_semantics = [], scalar_prefetch = 0 : i64, scratch_operands = 0 : i64, tpu.core_type = #tpu.core_type<tc>} {
    %c0 = arith.constant 0 : index
    %c0_0 = arith.constant 0 : index
    %0 = vector.load %arg0[%c0, %c0_0] : memref<16x128xf32, #tpu.memory_space<vmem>>, vector<16x128xf32>
    %c0_1 = arith.constant 0 : index
    %c0_2 = arith.constant 0 : index
    %1 = vector.load %arg1[%c0_1, %c0_2] : memref<16x16xf32, #tpu.memory_space<vmem>>, vector<16x16xf32>
    %c0_3 = arith.constant 0 : index
    %c0_4 = arith.constant 0 : index
    %c0_5 = arith.constant 0 : index
    %2 = vector.load %arg2[%c0_3, %c0_4, %c0_5] : memref<2x128x384xf32, #tpu.memory_space<vmem>>, vector<1x128x384xf32>
    %3 = vector.shape_cast %2 : vector<1x128x384xf32> to vector<128x384xf32>
    %cst = arith.constant dense<0.000000e+00> : vector<16x384xf32>
    %4 = tpu.matmul %0, %3, %cst {dimension_numbers = #tpu.dot_dimension_numbers<[1], [0], [0], [1], [0, 0, 1, 1], [], []>} : vector<16x128xf32>, vector<128x384xf32>, vector<16x384xf32> -> vector<16x384xf32>
    %c0_6 = arith.constant 0 : index
    %c0_7 = arith.constant 0 : index
    %c0_8 = arith.constant 0 : index
    %5 = vector.load %arg3[%c0_6, %c0_7, %c0_8] : memref<2x1x384xf32, #tpu.memory_space<vmem>>, vector<1x1x384xf32>
    %6 = vector.shape_cast %5 : vector<1x1x384xf32> to vector<1x384xf32>
    %7 = vector.broadcast %6 : vector<1x384xf32> to vector<16x384xf32>
    %8 = arith.addf %4, %7 : vector<16x384xf32>
    %9 = vector.extract_strided_slice %8 {offsets = [0, 0], sizes = [16, 128], strides = [1, 1]} : vector<16x384xf32> to vector<16x128xf32>
    %10 = vector.extract_strided_slice %8 {offsets = [0, 128], sizes = [16, 128], strides = [1, 1]} : vector<16x384xf32> to vector<16x128xf32>
    %11 = vector.extract_strided_slice %8 {offsets = [0, 256], sizes = [16, 128], strides = [1, 1]} : vector<16x384xf32> to vector<16x128xf32>
    %c0_9 = arith.constant 0 : index
    %c0_10 = arith.constant 0 : index
    %c0_11 = arith.constant 0 : index
    %12 = vector.load %arg4[%c0_9, %c0_10, %c0_11] : memref<2x128x128xf32, #tpu.memory_space<vmem>>, vector<1x128x128xf32>
    %13 = vector.shape_cast %12 : vector<1x128x128xf32> to vector<128x128xf32>
    %cst_12 = arith.constant 0.000000e+00 : f32
    %14 = vector.broadcast %cst_12 : f32 to vector<16x128xf32>
    %15 = vector.extract_strided_slice %9 {offsets = [0, 0], sizes = [16, 32], strides = [1, 1]} : vector<16x128xf32> to vector<16x32xf32>
    %16 = vector.extract_strided_slice %10 {offsets = [0, 0], sizes = [16, 32], strides = [1, 1]} : vector<16x128xf32> to vector<16x32xf32>
    %17 = vector.extract_strided_slice %11 {offsets = [0, 0], sizes = [16, 32], strides = [1, 1]} : vector<16x128xf32> to vector<16x32xf32>
    %cst_13 = arith.constant dense<0.000000e+00> : vector<16x16xf32>
    %18 = tpu.matmul %15, %16, %cst_13 {dimension_numbers = #tpu.dot_dimension_numbers<[1], [1], [0], [0], [0, 0, 1, 0], [], []>} : vector<16x32xf32>, vector<16x32xf32>, vector<16x16xf32> -> vector<16x16xf32>
    %cst_14 = arith.constant 0.176776692 : f32
    %19 = vector.broadcast %cst_14 : f32 to vector<16x16xf32>
    %20 = arith.mulf %18, %19 : vector<16x16xf32>
    %cst_15 = arith.constant 0.000000e+00 : f32
    %21 = vector.broadcast %cst_15 : f32 to vector<16x16xf32>
    %22 = arith.cmpf ogt, %1, %21 : vector<16x16xf32>
    %cst_16 = arith.constant -1.000000e+09 : f32
    %23 = vector.broadcast %cst_16 : f32 to vector<16x16xf32>
    %24 = arith.select %22, %20, %23 : vector<16x16xi1>, vector<16x16xf32>
    %cst_17 = arith.constant dense<0xFF800000> : vector<16xf32>
    %25 = vector.multi_reduction <maximumf>, %24, %cst_17 [1] : vector<16x16xf32> to vector<16xf32>
    %26 = vector.shape_cast %25 : vector<16xf32> to vector<16x1xf32>
    %27 = vector.broadcast %26 : vector<16x1xf32> to vector<16x16xf32>
    %28 = arith.subf %24, %27 : vector<16x16xf32>
    %29 = math.exp %28 : vector<16x16xf32>
    %cst_18 = arith.constant dense<0.000000e+00> : vector<16xf32>
    %30 = vector.multi_reduction <add>, %29, %cst_18 [1] : vector<16x16xf32> to vector<16xf32>
    %31 = vector.shape_cast %30 : vector<16xf32> to vector<16x1xf32>
    %32 = tpu.reciprocal %31 {approx = true} : vector<16x1xf32> -> vector<16x1xf32>
    %33 = vector.broadcast %32 : vector<16x1xf32> to vector<16x16xf32>
    %34 = arith.mulf %29, %33 : vector<16x16xf32>
    %cst_19 = arith.constant dense<0.000000e+00> : vector<16x32xf32>
    %35 = tpu.matmul %34, %17, %cst_19 {dimension_numbers = #tpu.dot_dimension_numbers<[1], [0], [0], [1], [0, 0, 1, 1], [], []>} : vector<16x16xf32>, vector<16x32xf32>, vector<16x32xf32> -> vector<16x32xf32>
    %36 = vector.extract_strided_slice %13 {offsets = [0, 0], sizes = [32, 128], strides = [1, 1]} : vector<128x128xf32> to vector<32x128xf32>
    %cst_20 = arith.constant dense<0.000000e+00> : vector<16x128xf32>
    %37 = tpu.matmul %35, %36, %cst_20 {dimension_numbers = #tpu.dot_dimension_numbers<[1], [0], [0], [1], [0, 0, 1, 1], [], []>} : vector<16x32xf32>, vector<32x128xf32>, vector<16x128xf32> -> vector<16x128xf32>
    %38 = arith.addf %14, %37 : vector<16x128xf32>
    %39 = vector.extract_strided_slice %9 {offsets = [0, 32], sizes = [16, 32], strides = [1, 1]} : vector<16x128xf32> to vector<16x32xf32>
    %40 = vector.extract_strided_slice %10 {offsets = [0, 32], sizes = [16, 32], strides = [1, 1]} : vector<16x128xf32> to vector<16x32xf32>
    %41 = vector.extract_strided_slice %11 {offsets = [0, 32], sizes = [16, 32], strides = [1, 1]} : vector<16x128xf32> to vector<16x32xf32>
    %cst_21 = arith.constant dense<0.000000e+00> : vector<16x16xf32>
    %42 = tpu.matmul %39, %40, %cst_21 {dimension_numbers = #tpu.dot_dimension_numbers<[1], [1], [0], [0], [0, 0, 1, 0], [], []>} : vector<16x32xf32>, vector<16x32xf32>, vector<16x16xf32> -> vector<16x16xf32>
    %cst_22 = arith.constant 0.176776692 : f32
    %43 = vector.broadcast %cst_22 : f32 to vector<16x16xf32>
    %44 = arith.mulf %42, %43 : vector<16x16xf32>
    %cst_23 = arith.constant 0.000000e+00 : f32
    %45 = vector.broadcast %cst_23 : f32 to vector<16x16xf32>
    %46 = arith.cmpf ogt, %1, %45 : vector<16x16xf32>
    %cst_24 = arith.constant -1.000000e+09 : f32
    %47 = vector.broadcast %cst_24 : f32 to vector<16x16xf32>
    %48 = arith.select %46, %44, %47 : vector<16x16xi1>, vector<16x16xf32>
    %cst_25 = arith.constant dense<0xFF800000> : vector<16xf32>
    %49 = vector.multi_reduction <maximumf>, %48, %cst_25 [1] : vector<16x16xf32> to vector<16xf32>
    %50 = vector.shape_cast %49 : vector<16xf32> to vector<16x1xf32>
    %51 = vector.broadcast %50 : vector<16x1xf32> to vector<16x16xf32>
    %52 = arith.subf %48, %51 : vector<16x16xf32>
    %53 = math.exp %52 : vector<16x16xf32>
    %cst_26 = arith.constant dense<0.000000e+00> : vector<16xf32>
    %54 = vector.multi_reduction <add>, %53, %cst_26 [1] : vector<16x16xf32> to vector<16xf32>
    %55 = vector.shape_cast %54 : vector<16xf32> to vector<16x1xf32>
    %56 = tpu.reciprocal %55 {approx = true} : vector<16x1xf32> -> vector<16x1xf32>
    %57 = vector.broadcast %56 : vector<16x1xf32> to vector<16x16xf32>
    %58 = arith.mulf %53, %57 : vector<16x16xf32>
    %cst_27 = arith.constant dense<0.000000e+00> : vector<16x32xf32>
    %59 = tpu.matmul %58, %41, %cst_27 {dimension_numbers = #tpu.dot_dimension_numbers<[1], [0], [0], [1], [0, 0, 1, 1], [], []>} : vector<16x16xf32>, vector<16x32xf32>, vector<16x32xf32> -> vector<16x32xf32>
    %60 = vector.extract_strided_slice %13 {offsets = [32, 0], sizes = [32, 128], strides = [1, 1]} : vector<128x128xf32> to vector<32x128xf32>
    %cst_28 = arith.constant dense<0.000000e+00> : vector<16x128xf32>
    %61 = tpu.matmul %59, %60, %cst_28 {dimension_numbers = #tpu.dot_dimension_numbers<[1], [0], [0], [1], [0, 0, 1, 1], [], []>} : vector<16x32xf32>, vector<32x128xf32>, vector<16x128xf32> -> vector<16x128xf32>
    %62 = arith.addf %38, %61 : vector<16x128xf32>
    %63 = vector.extract_strided_slice %9 {offsets = [0, 64], sizes = [16, 32], strides = [1, 1]} : vector<16x128xf32> to vector<16x32xf32>
    %64 = vector.extract_strided_slice %10 {offsets = [0, 64], sizes = [16, 32], strides = [1, 1]} : vector<16x128xf32> to vector<16x32xf32>
    %65 = vector.extract_strided_slice %11 {offsets = [0, 64], sizes = [16, 32], strides = [1, 1]} : vector<16x128xf32> to vector<16x32xf32>
    %cst_29 = arith.constant dense<0.000000e+00> : vector<16x16xf32>
    %66 = tpu.matmul %63, %64, %cst_29 {dimension_numbers = #tpu.dot_dimension_numbers<[1], [1], [0], [0], [0, 0, 1, 0], [], []>} : vector<16x32xf32>, vector<16x32xf32>, vector<16x16xf32> -> vector<16x16xf32>
    %cst_30 = arith.constant 0.176776692 : f32
    %67 = vector.broadcast %cst_30 : f32 to vector<16x16xf32>
    %68 = arith.mulf %66, %67 : vector<16x16xf32>
    %cst_31 = arith.constant 0.000000e+00 : f32
    %69 = vector.broadcast %cst_31 : f32 to vector<16x16xf32>
    %70 = arith.cmpf ogt, %1, %69 : vector<16x16xf32>
    %cst_32 = arith.constant -1.000000e+09 : f32
    %71 = vector.broadcast %cst_32 : f32 to vector<16x16xf32>
    %72 = arith.select %70, %68, %71 : vector<16x16xi1>, vector<16x16xf32>
    %cst_33 = arith.constant dense<0xFF800000> : vector<16xf32>
    %73 = vector.multi_reduction <maximumf>, %72, %cst_33 [1] : vector<16x16xf32> to vector<16xf32>
    %74 = vector.shape_cast %73 : vector<16xf32> to vector<16x1xf32>
    %75 = vector.broadcast %74 : vector<16x1xf32> to vector<16x16xf32>
    %76 = arith.subf %72, %75 : vector<16x16xf32>
    %77 = math.exp %76 : vector<16x16xf32>
    %cst_34 = arith.constant dense<0.000000e+00> : vector<16xf32>
    %78 = vector.multi_reduction <add>, %77, %cst_34 [1] : vector<16x16xf32> to vector<16xf32>
    %79 = vector.shape_cast %78 : vector<16xf32> to vector<16x1xf32>
    %80 = tpu.reciprocal %79 {approx = true} : vector<16x1xf32> -> vector<16x1xf32>
    %81 = vector.broadcast %80 : vector<16x1xf32> to vector<16x16xf32>
    %82 = arith.mulf %77, %81 : vector<16x16xf32>
    %cst_35 = arith.constant dense<0.000000e+00> : vector<16x32xf32>
    %83 = tpu.matmul %82, %65, %cst_35 {dimension_numbers = #tpu.dot_dimension_numbers<[1], [0], [0], [1], [0, 0, 1, 1], [], []>} : vector<16x16xf32>, vector<16x32xf32>, vector<16x32xf32> -> vector<16x32xf32>
    %84 = vector.extract_strided_slice %13 {offsets = [64, 0], sizes = [32, 128], strides = [1, 1]} : vector<128x128xf32> to vector<32x128xf32>
    %cst_36 = arith.constant dense<0.000000e+00> : vector<16x128xf32>
    %85 = tpu.matmul %83, %84, %cst_36 {dimension_numbers = #tpu.dot_dimension_numbers<[1], [0], [0], [1], [0, 0, 1, 1], [], []>} : vector<16x32xf32>, vector<32x128xf32>, vector<16x128xf32> -> vector<16x128xf32>
    %86 = arith.addf %62, %85 : vector<16x128xf32>
    %87 = vector.extract_strided_slice %9 {offsets = [0, 96], sizes = [16, 32], strides = [1, 1]} : vector<16x128xf32> to vector<16x32xf32>
    %88 = vector.extract_strided_slice %10 {offsets = [0, 96], sizes = [16, 32], strides = [1, 1]} : vector<16x128xf32> to vector<16x32xf32>
    %89 = vector.extract_strided_slice %11 {offsets = [0, 96], sizes = [16, 32], strides = [1, 1]} : vector<16x128xf32> to vector<16x32xf32>
    %cst_37 = arith.constant dense<0.000000e+00> : vector<16x16xf32>
    %90 = tpu.matmul %87, %88, %cst_37 {dimension_numbers = #tpu.dot_dimension_numbers<[1], [1], [0], [0], [0, 0, 1, 0], [], []>} : vector<16x32xf32>, vector<16x32xf32>, vector<16x16xf32> -> vector<16x16xf32>
    %cst_38 = arith.constant 0.176776692 : f32
    %91 = vector.broadcast %cst_38 : f32 to vector<16x16xf32>
    %92 = arith.mulf %90, %91 : vector<16x16xf32>
    %cst_39 = arith.constant 0.000000e+00 : f32
    %93 = vector.broadcast %cst_39 : f32 to vector<16x16xf32>
    %94 = arith.cmpf ogt, %1, %93 : vector<16x16xf32>
    %cst_40 = arith.constant -1.000000e+09 : f32
    %95 = vector.broadcast %cst_40 : f32 to vector<16x16xf32>
    %96 = arith.select %94, %92, %95 : vector<16x16xi1>, vector<16x16xf32>
    %cst_41 = arith.constant dense<0xFF800000> : vector<16xf32>
    %97 = vector.multi_reduction <maximumf>, %96, %cst_41 [1] : vector<16x16xf32> to vector<16xf32>
    %98 = vector.shape_cast %97 : vector<16xf32> to vector<16x1xf32>
    %99 = vector.broadcast %98 : vector<16x1xf32> to vector<16x16xf32>
    %100 = arith.subf %96, %99 : vector<16x16xf32>
    %101 = math.exp %100 : vector<16x16xf32>
    %cst_42 = arith.constant dense<0.000000e+00> : vector<16xf32>
    %102 = vector.multi_reduction <add>, %101, %cst_42 [1] : vector<16x16xf32> to vector<16xf32>
    %103 = vector.shape_cast %102 : vector<16xf32> to vector<16x1xf32>
    %104 = tpu.reciprocal %103 {approx = true} : vector<16x1xf32> -> vector<16x1xf32>
    %105 = vector.broadcast %104 : vector<16x1xf32> to vector<16x16xf32>
    %106 = arith.mulf %101, %105 : vector<16x16xf32>
    %cst_43 = arith.constant dense<0.000000e+00> : vector<16x32xf32>
    %107 = tpu.matmul %106, %89, %cst_43 {dimension_numbers = #tpu.dot_dimension_numbers<[1], [0], [0], [1], [0, 0, 1, 1], [], []>} : vector<16x16xf32>, vector<16x32xf32>, vector<16x32xf32> -> vector<16x32xf32>
    %108 = vector.extract_strided_slice %13 {offsets = [96, 0], sizes = [32, 128], strides = [1, 1]} : vector<128x128xf32> to vector<32x128xf32>
    %cst_44 = arith.constant dense<0.000000e+00> : vector<16x128xf32>
    %109 = tpu.matmul %107, %108, %cst_44 {dimension_numbers = #tpu.dot_dimension_numbers<[1], [0], [0], [1], [0, 0, 1, 1], [], []>} : vector<16x32xf32>, vector<32x128xf32>, vector<16x128xf32> -> vector<16x128xf32>
    %110 = arith.addf %86, %109 : vector<16x128xf32>
    %c0_45 = arith.constant 0 : index
    %c0_46 = arith.constant 0 : index
    %c0_47 = arith.constant 0 : index
    %111 = vector.load %arg5[%c0_45, %c0_46, %c0_47] : memref<2x1x128xf32, #tpu.memory_space<vmem>>, vector<1x1x128xf32>
    %112 = vector.shape_cast %111 : vector<1x1x128xf32> to vector<1x128xf32>
    %113 = vector.broadcast %112 : vector<1x128xf32> to vector<16x128xf32>
    %114 = arith.addf %110, %113 : vector<16x128xf32>
    %115 = arith.addf %0, %114 : vector<16x128xf32>
    %c0_48 = arith.constant 0 : index
    %c0_49 = arith.constant 0 : index
    %c0_50 = arith.constant 0 : index
    %116 = vector.load %arg6[%c0_48, %c0_49, %c0_50] : memref<2x1x128xf32, #tpu.memory_space<vmem>>, vector<1x1x128xf32>
    %117 = vector.shape_cast %116 : vector<1x1x128xf32> to vector<1x128xf32>
    %c0_51 = arith.constant 0 : index
    %c0_52 = arith.constant 0 : index
    %c0_53 = arith.constant 0 : index
    %118 = vector.load %arg7[%c0_51, %c0_52, %c0_53] : memref<2x1x128xf32, #tpu.memory_space<vmem>>, vector<1x1x128xf32>
    %119 = vector.shape_cast %118 : vector<1x1x128xf32> to vector<1x128xf32>
    %cst_54 = arith.constant dense<0.000000e+00> : vector<16xf32>
    %120 = vector.multi_reduction <add>, %115, %cst_54 [1] : vector<16x128xf32> to vector<16xf32>
    %121 = vector.shape_cast %120 : vector<16xf32> to vector<16x1xf32>
    %cst_55 = arith.constant 1.280000e+02 : f32
    %122 = vector.broadcast %cst_55 : f32 to vector<16x1xf32>
    %123 = arith.divf %121, %122 : vector<16x1xf32>
    %124 = vector.broadcast %123 : vector<16x1xf32> to vector<16x128xf32>
    %125 = arith.subf %115, %124 : vector<16x128xf32>
    %126 = arith.mulf %125, %125 : vector<16x128xf32>
    %cst_56 = arith.constant dense<0.000000e+00> : vector<16xf32>
    %127 = vector.multi_reduction <add>, %126, %cst_56 [1] : vector<16x128xf32> to vector<16xf32>
    %128 = vector.shape_cast %127 : vector<16xf32> to vector<16x1xf32>
    %cst_57 = arith.constant 1.280000e+02 : f32
    %129 = vector.broadcast %cst_57 : f32 to vector<16x1xf32>
    %130 = arith.divf %128, %129 : vector<16x1xf32>
    %131 = vector.broadcast %123 : vector<16x1xf32> to vector<16x128xf32>
    %132 = arith.subf %115, %131 : vector<16x128xf32>
    %cst_58 = arith.constant 9.99999974E-6 : f32
    %133 = vector.broadcast %cst_58 : f32 to vector<16x1xf32>
    %134 = arith.addf %130, %133 : vector<16x1xf32>
    %135 = math.rsqrt %134 : vector<16x1xf32>
    %136 = vector.broadcast %135 : vector<16x1xf32> to vector<16x128xf32>
    %137 = arith.mulf %132, %136 : vector<16x128xf32>
    %138 = vector.broadcast %117 : vector<1x128xf32> to vector<16x128xf32>
    %139 = arith.mulf %137, %138 : vector<16x128xf32>
    %140 = vector.broadcast %119 : vector<1x128xf32> to vector<16x128xf32>
    %141 = arith.addf %139, %140 : vector<16x128xf32>
    %c0_59 = arith.constant 0 : index
    %c0_60 = arith.constant 0 : index
    %c0_61 = arith.constant 0 : index
    %142 = vector.load %arg8[%c0_59, %c0_60, %c0_61] : memref<2x128x256xf32, #tpu.memory_space<vmem>>, vector<1x128x256xf32>
    %143 = vector.shape_cast %142 : vector<1x128x256xf32> to vector<128x256xf32>
    %cst_62 = arith.constant dense<0.000000e+00> : vector<16x256xf32>
    %144 = tpu.matmul %141, %143, %cst_62 {dimension_numbers = #tpu.dot_dimension_numbers<[1], [0], [0], [1], [0, 0, 1, 1], [], []>} : vector<16x128xf32>, vector<128x256xf32>, vector<16x256xf32> -> vector<16x256xf32>
    %c0_63 = arith.constant 0 : index
    %c0_64 = arith.constant 0 : index
    %c0_65 = arith.constant 0 : index
    %145 = vector.load %arg9[%c0_63, %c0_64, %c0_65] : memref<2x1x256xf32, #tpu.memory_space<vmem>>, vector<1x1x256xf32>
    %146 = vector.shape_cast %145 : vector<1x1x256xf32> to vector<1x256xf32>
    %147 = vector.broadcast %146 : vector<1x256xf32> to vector<16x256xf32>
    %148 = arith.addf %144, %147 : vector<16x256xf32>
    %cst_66 = arith.constant 0.000000e+00 : f32
    %149 = vector.broadcast %cst_66 : f32 to vector<16x256xf32>
    %150 = arith.maximumf %148, %149 : vector<16x256xf32>
    %c0_67 = arith.constant 0 : index
    %c0_68 = arith.constant 0 : index
    %c0_69 = arith.constant 0 : index
    %151 = vector.load %arg10[%c0_67, %c0_68, %c0_69] : memref<2x256x128xf32, #tpu.memory_space<vmem>>, vector<1x256x128xf32>
    %152 = vector.shape_cast %151 : vector<1x256x128xf32> to vector<256x128xf32>
    %cst_70 = arith.constant dense<0.000000e+00> : vector<16x128xf32>
    %153 = tpu.matmul %150, %152, %cst_70 {dimension_numbers = #tpu.dot_dimension_numbers<[1], [0], [0], [1], [0, 0, 1, 1], [], []>} : vector<16x256xf32>, vector<256x128xf32>, vector<16x128xf32> -> vector<16x128xf32>
    %c0_71 = arith.constant 0 : index
    %c0_72 = arith.constant 0 : index
    %c0_73 = arith.constant 0 : index
    %154 = vector.load %arg11[%c0_71, %c0_72, %c0_73] : memref<2x1x128xf32, #tpu.memory_space<vmem>>, vector<1x1x128xf32>
    %155 = vector.shape_cast %154 : vector<1x1x128xf32> to vector<1x128xf32>
    %156 = vector.broadcast %155 : vector<1x128xf32> to vector<16x128xf32>
    %157 = arith.addf %153, %156 : vector<16x128xf32>
    %158 = arith.addf %141, %157 : vector<16x128xf32>
    %c0_74 = arith.constant 0 : index
    %c0_75 = arith.constant 0 : index
    %c0_76 = arith.constant 0 : index
    %159 = vector.load %arg12[%c0_74, %c0_75, %c0_76] : memref<2x1x128xf32, #tpu.memory_space<vmem>>, vector<1x1x128xf32>
    %160 = vector.shape_cast %159 : vector<1x1x128xf32> to vector<1x128xf32>
    %c0_77 = arith.constant 0 : index
    %c0_78 = arith.constant 0 : index
    %c0_79 = arith.constant 0 : index
    %161 = vector.load %arg13[%c0_77, %c0_78, %c0_79] : memref<2x1x128xf32, #tpu.memory_space<vmem>>, vector<1x1x128xf32>
    %162 = vector.shape_cast %161 : vector<1x1x128xf32> to vector<1x128xf32>
    %cst_80 = arith.constant dense<0.000000e+00> : vector<16xf32>
    %163 = vector.multi_reduction <add>, %158, %cst_80 [1] : vector<16x128xf32> to vector<16xf32>
    %164 = vector.shape_cast %163 : vector<16xf32> to vector<16x1xf32>
    %cst_81 = arith.constant 1.280000e+02 : f32
    %165 = vector.broadcast %cst_81 : f32 to vector<16x1xf32>
    %166 = arith.divf %164, %165 : vector<16x1xf32>
    %167 = vector.broadcast %166 : vector<16x1xf32> to vector<16x128xf32>
    %168 = arith.subf %158, %167 : vector<16x128xf32>
    %169 = arith.mulf %168, %168 : vector<16x128xf32>
    %cst_82 = arith.constant dense<0.000000e+00> : vector<16xf32>
    %170 = vector.multi_reduction <add>, %169, %cst_82 [1] : vector<16x128xf32> to vector<16xf32>
    %171 = vector.shape_cast %170 : vector<16xf32> to vector<16x1xf32>
    %cst_83 = arith.constant 1.280000e+02 : f32
    %172 = vector.broadcast %cst_83 : f32 to vector<16x1xf32>
    %173 = arith.divf %171, %172 : vector<16x1xf32>
    %174 = vector.broadcast %166 : vector<16x1xf32> to vector<16x128xf32>
    %175 = arith.subf %158, %174 : vector<16x128xf32>
    %cst_84 = arith.constant 9.99999974E-6 : f32
    %176 = vector.broadcast %cst_84 : f32 to vector<16x1xf32>
    %177 = arith.addf %173, %176 : vector<16x1xf32>
    %178 = math.rsqrt %177 : vector<16x1xf32>
    %179 = vector.broadcast %178 : vector<16x1xf32> to vector<16x128xf32>
    %180 = arith.mulf %175, %179 : vector<16x128xf32>
    %181 = vector.broadcast %160 : vector<1x128xf32> to vector<16x128xf32>
    %182 = arith.mulf %180, %181 : vector<16x128xf32>
    %183 = vector.broadcast %162 : vector<1x128xf32> to vector<16x128xf32>
    %184 = arith.addf %182, %183 : vector<16x128xf32>
    %c1 = arith.constant 1 : index
    %c0_85 = arith.constant 0 : index
    %c0_86 = arith.constant 0 : index
    %185 = vector.load %arg2[%c1, %c0_85, %c0_86] : memref<2x128x384xf32, #tpu.memory_space<vmem>>, vector<1x128x384xf32>
    %186 = vector.shape_cast %185 : vector<1x128x384xf32> to vector<128x384xf32>
    %cst_87 = arith.constant dense<0.000000e+00> : vector<16x384xf32>
    %187 = tpu.matmul %184, %186, %cst_87 {dimension_numbers = #tpu.dot_dimension_numbers<[1], [0], [0], [1], [0, 0, 1, 1], [], []>} : vector<16x128xf32>, vector<128x384xf32>, vector<16x384xf32> -> vector<16x384xf32>
    %c1_88 = arith.constant 1 : index
    %c0_89 = arith.constant 0 : index
    %c0_90 = arith.constant 0 : index
    %188 = vector.load %arg3[%c1_88, %c0_89, %c0_90] : memref<2x1x384xf32, #tpu.memory_space<vmem>>, vector<1x1x384xf32>
    %189 = vector.shape_cast %188 : vector<1x1x384xf32> to vector<1x384xf32>
    %190 = vector.broadcast %189 : vector<1x384xf32> to vector<16x384xf32>
    %191 = arith.addf %187, %190 : vector<16x384xf32>
    %192 = vector.extract_strided_slice %191 {offsets = [0, 0], sizes = [16, 128], strides = [1, 1]} : vector<16x384xf32> to vector<16x128xf32>
    %193 = vector.extract_strided_slice %191 {offsets = [0, 128], sizes = [16, 128], strides = [1, 1]} : vector<16x384xf32> to vector<16x128xf32>
    %194 = vector.extract_strided_slice %191 {offsets = [0, 256], sizes = [16, 128], strides = [1, 1]} : vector<16x384xf32> to vector<16x128xf32>
    %c1_91 = arith.constant 1 : index
    %c0_92 = arith.constant 0 : index
    %c0_93 = arith.constant 0 : index
    %195 = vector.load %arg4[%c1_91, %c0_92, %c0_93] : memref<2x128x128xf32, #tpu.memory_space<vmem>>, vector<1x128x128xf32>
    %196 = vector.shape_cast %195 : vector<1x128x128xf32> to vector<128x128xf32>
    %cst_94 = arith.constant 0.000000e+00 : f32
    %197 = vector.broadcast %cst_94 : f32 to vector<16x128xf32>
    %198 = vector.extract_strided_slice %192 {offsets = [0, 0], sizes = [16, 32], strides = [1, 1]} : vector<16x128xf32> to vector<16x32xf32>
    %199 = vector.extract_strided_slice %193 {offsets = [0, 0], sizes = [16, 32], strides = [1, 1]} : vector<16x128xf32> to vector<16x32xf32>
    %200 = vector.extract_strided_slice %194 {offsets = [0, 0], sizes = [16, 32], strides = [1, 1]} : vector<16x128xf32> to vector<16x32xf32>
    %cst_95 = arith.constant dense<0.000000e+00> : vector<16x16xf32>
    %201 = tpu.matmul %198, %199, %cst_95 {dimension_numbers = #tpu.dot_dimension_numbers<[1], [1], [0], [0], [0, 0, 1, 0], [], []>} : vector<16x32xf32>, vector<16x32xf32>, vector<16x16xf32> -> vector<16x16xf32>
    %cst_96 = arith.constant 0.176776692 : f32
    %202 = vector.broadcast %cst_96 : f32 to vector<16x16xf32>
    %203 = arith.mulf %201, %202 : vector<16x16xf32>
    %cst_97 = arith.constant 0.000000e+00 : f32
    %204 = vector.broadcast %cst_97 : f32 to vector<16x16xf32>
    %205 = arith.cmpf ogt, %1, %204 : vector<16x16xf32>
    %cst_98 = arith.constant -1.000000e+09 : f32
    %206 = vector.broadcast %cst_98 : f32 to vector<16x16xf32>
    %207 = arith.select %205, %203, %206 : vector<16x16xi1>, vector<16x16xf32>
    %cst_99 = arith.constant dense<0xFF800000> : vector<16xf32>
    %208 = vector.multi_reduction <maximumf>, %207, %cst_99 [1] : vector<16x16xf32> to vector<16xf32>
    %209 = vector.shape_cast %208 : vector<16xf32> to vector<16x1xf32>
    %210 = vector.broadcast %209 : vector<16x1xf32> to vector<16x16xf32>
    %211 = arith.subf %207, %210 : vector<16x16xf32>
    %212 = math.exp %211 : vector<16x16xf32>
    %cst_100 = arith.constant dense<0.000000e+00> : vector<16xf32>
    %213 = vector.multi_reduction <add>, %212, %cst_100 [1] : vector<16x16xf32> to vector<16xf32>
    %214 = vector.shape_cast %213 : vector<16xf32> to vector<16x1xf32>
    %215 = tpu.reciprocal %214 {approx = true} : vector<16x1xf32> -> vector<16x1xf32>
    %216 = vector.broadcast %215 : vector<16x1xf32> to vector<16x16xf32>
    %217 = arith.mulf %212, %216 : vector<16x16xf32>
    %cst_101 = arith.constant dense<0.000000e+00> : vector<16x32xf32>
    %218 = tpu.matmul %217, %200, %cst_101 {dimension_numbers = #tpu.dot_dimension_numbers<[1], [0], [0], [1], [0, 0, 1, 1], [], []>} : vector<16x16xf32>, vector<16x32xf32>, vector<16x32xf32> -> vector<16x32xf32>
    %219 = vector.extract_strided_slice %196 {offsets = [0, 0], sizes = [32, 128], strides = [1, 1]} : vector<128x128xf32> to vector<32x128xf32>
    %cst_102 = arith.constant dense<0.000000e+00> : vector<16x128xf32>
    %220 = tpu.matmul %218, %219, %cst_102 {dimension_numbers = #tpu.dot_dimension_numbers<[1], [0], [0], [1], [0, 0, 1, 1], [], []>} : vector<16x32xf32>, vector<32x128xf32>, vector<16x128xf32> -> vector<16x128xf32>
    %221 = arith.addf %197, %220 : vector<16x128xf32>
    %222 = vector.extract_strided_slice %192 {offsets = [0, 32], sizes = [16, 32], strides = [1, 1]} : vector<16x128xf32> to vector<16x32xf32>
    %223 = vector.extract_strided_slice %193 {offsets = [0, 32], sizes = [16, 32], strides = [1, 1]} : vector<16x128xf32> to vector<16x32xf32>
    %224 = vector.extract_strided_slice %194 {offsets = [0, 32], sizes = [16, 32], strides = [1, 1]} : vector<16x128xf32> to vector<16x32xf32>
    %cst_103 = arith.constant dense<0.000000e+00> : vector<16x16xf32>
    %225 = tpu.matmul %222, %223, %cst_103 {dimension_numbers = #tpu.dot_dimension_numbers<[1], [1], [0], [0], [0, 0, 1, 0], [], []>} : vector<16x32xf32>, vector<16x32xf32>, vector<16x16xf32> -> vector<16x16xf32>
    %cst_104 = arith.constant 0.176776692 : f32
    %226 = vector.broadcast %cst_104 : f32 to vector<16x16xf32>
    %227 = arith.mulf %225, %226 : vector<16x16xf32>
    %cst_105 = arith.constant 0.000000e+00 : f32
    %228 = vector.broadcast %cst_105 : f32 to vector<16x16xf32>
    %229 = arith.cmpf ogt, %1, %228 : vector<16x16xf32>
    %cst_106 = arith.constant -1.000000e+09 : f32
    %230 = vector.broadcast %cst_106 : f32 to vector<16x16xf32>
    %231 = arith.select %229, %227, %230 : vector<16x16xi1>, vector<16x16xf32>
    %cst_107 = arith.constant dense<0xFF800000> : vector<16xf32>
    %232 = vector.multi_reduction <maximumf>, %231, %cst_107 [1] : vector<16x16xf32> to vector<16xf32>
    %233 = vector.shape_cast %232 : vector<16xf32> to vector<16x1xf32>
    %234 = vector.broadcast %233 : vector<16x1xf32> to vector<16x16xf32>
    %235 = arith.subf %231, %234 : vector<16x16xf32>
    %236 = math.exp %235 : vector<16x16xf32>
    %cst_108 = arith.constant dense<0.000000e+00> : vector<16xf32>
    %237 = vector.multi_reduction <add>, %236, %cst_108 [1] : vector<16x16xf32> to vector<16xf32>
    %238 = vector.shape_cast %237 : vector<16xf32> to vector<16x1xf32>
    %239 = tpu.reciprocal %238 {approx = true} : vector<16x1xf32> -> vector<16x1xf32>
    %240 = vector.broadcast %239 : vector<16x1xf32> to vector<16x16xf32>
    %241 = arith.mulf %236, %240 : vector<16x16xf32>
    %cst_109 = arith.constant dense<0.000000e+00> : vector<16x32xf32>
    %242 = tpu.matmul %241, %224, %cst_109 {dimension_numbers = #tpu.dot_dimension_numbers<[1], [0], [0], [1], [0, 0, 1, 1], [], []>} : vector<16x16xf32>, vector<16x32xf32>, vector<16x32xf32> -> vector<16x32xf32>
    %243 = vector.extract_strided_slice %196 {offsets = [32, 0], sizes = [32, 128], strides = [1, 1]} : vector<128x128xf32> to vector<32x128xf32>
    %cst_110 = arith.constant dense<0.000000e+00> : vector<16x128xf32>
    %244 = tpu.matmul %242, %243, %cst_110 {dimension_numbers = #tpu.dot_dimension_numbers<[1], [0], [0], [1], [0, 0, 1, 1], [], []>} : vector<16x32xf32>, vector<32x128xf32>, vector<16x128xf32> -> vector<16x128xf32>
    %245 = arith.addf %221, %244 : vector<16x128xf32>
    %246 = vector.extract_strided_slice %192 {offsets = [0, 64], sizes = [16, 32], strides = [1, 1]} : vector<16x128xf32> to vector<16x32xf32>
    %247 = vector.extract_strided_slice %193 {offsets = [0, 64], sizes = [16, 32], strides = [1, 1]} : vector<16x128xf32> to vector<16x32xf32>
    %248 = vector.extract_strided_slice %194 {offsets = [0, 64], sizes = [16, 32], strides = [1, 1]} : vector<16x128xf32> to vector<16x32xf32>
    %cst_111 = arith.constant dense<0.000000e+00> : vector<16x16xf32>
    %249 = tpu.matmul %246, %247, %cst_111 {dimension_numbers = #tpu.dot_dimension_numbers<[1], [1], [0], [0], [0, 0, 1, 0], [], []>} : vector<16x32xf32>, vector<16x32xf32>, vector<16x16xf32> -> vector<16x16xf32>
    %cst_112 = arith.constant 0.176776692 : f32
    %250 = vector.broadcast %cst_112 : f32 to vector<16x16xf32>
    %251 = arith.mulf %249, %250 : vector<16x16xf32>
    %cst_113 = arith.constant 0.000000e+00 : f32
    %252 = vector.broadcast %cst_113 : f32 to vector<16x16xf32>
    %253 = arith.cmpf ogt, %1, %252 : vector<16x16xf32>
    %cst_114 = arith.constant -1.000000e+09 : f32
    %254 = vector.broadcast %cst_114 : f32 to vector<16x16xf32>
    %255 = arith.select %253, %251, %254 : vector<16x16xi1>, vector<16x16xf32>
    %cst_115 = arith.constant dense<0xFF800000> : vector<16xf32>
    %256 = vector.multi_reduction <maximumf>, %255, %cst_115 [1] : vector<16x16xf32> to vector<16xf32>
    %257 = vector.shape_cast %256 : vector<16xf32> to vector<16x1xf32>
    %258 = vector.broadcast %257 : vector<16x1xf32> to vector<16x16xf32>
    %259 = arith.subf %255, %258 : vector<16x16xf32>
    %260 = math.exp %259 : vector<16x16xf32>
    %cst_116 = arith.constant dense<0.000000e+00> : vector<16xf32>
    %261 = vector.multi_reduction <add>, %260, %cst_116 [1] : vector<16x16xf32> to vector<16xf32>
    %262 = vector.shape_cast %261 : vector<16xf32> to vector<16x1xf32>
    %263 = tpu.reciprocal %262 {approx = true} : vector<16x1xf32> -> vector<16x1xf32>
    %264 = vector.broadcast %263 : vector<16x1xf32> to vector<16x16xf32>
    %265 = arith.mulf %260, %264 : vector<16x16xf32>
    %cst_117 = arith.constant dense<0.000000e+00> : vector<16x32xf32>
    %266 = tpu.matmul %265, %248, %cst_117 {dimension_numbers = #tpu.dot_dimension_numbers<[1], [0], [0], [1], [0, 0, 1, 1], [], []>} : vector<16x16xf32>, vector<16x32xf32>, vector<16x32xf32> -> vector<16x32xf32>
    %267 = vector.extract_strided_slice %196 {offsets = [64, 0], sizes = [32, 128], strides = [1, 1]} : vector<128x128xf32> to vector<32x128xf32>
    %cst_118 = arith.constant dense<0.000000e+00> : vector<16x128xf32>
    %268 = tpu.matmul %266, %267, %cst_118 {dimension_numbers = #tpu.dot_dimension_numbers<[1], [0], [0], [1], [0, 0, 1, 1], [], []>} : vector<16x32xf32>, vector<32x128xf32>, vector<16x128xf32> -> vector<16x128xf32>
    %269 = arith.addf %245, %268 : vector<16x128xf32>
    %270 = vector.extract_strided_slice %192 {offsets = [0, 96], sizes = [16, 32], strides = [1, 1]} : vector<16x128xf32> to vector<16x32xf32>
    %271 = vector.extract_strided_slice %193 {offsets = [0, 96], sizes = [16, 32], strides = [1, 1]} : vector<16x128xf32> to vector<16x32xf32>
    %272 = vector.extract_strided_slice %194 {offsets = [0, 96], sizes = [16, 32], strides = [1, 1]} : vector<16x128xf32> to vector<16x32xf32>
    %cst_119 = arith.constant dense<0.000000e+00> : vector<16x16xf32>
    %273 = tpu.matmul %270, %271, %cst_119 {dimension_numbers = #tpu.dot_dimension_numbers<[1], [1], [0], [0], [0, 0, 1, 0], [], []>} : vector<16x32xf32>, vector<16x32xf32>, vector<16x16xf32> -> vector<16x16xf32>
    %cst_120 = arith.constant 0.176776692 : f32
    %274 = vector.broadcast %cst_120 : f32 to vector<16x16xf32>
    %275 = arith.mulf %273, %274 : vector<16x16xf32>
    %cst_121 = arith.constant 0.000000e+00 : f32
    %276 = vector.broadcast %cst_121 : f32 to vector<16x16xf32>
    %277 = arith.cmpf ogt, %1, %276 : vector<16x16xf32>
    %cst_122 = arith.constant -1.000000e+09 : f32
    %278 = vector.broadcast %cst_122 : f32 to vector<16x16xf32>
    %279 = arith.select %277, %275, %278 : vector<16x16xi1>, vector<16x16xf32>
    %cst_123 = arith.constant dense<0xFF800000> : vector<16xf32>
    %280 = vector.multi_reduction <maximumf>, %279, %cst_123 [1] : vector<16x16xf32> to vector<16xf32>
    %281 = vector.shape_cast %280 : vector<16xf32> to vector<16x1xf32>
    %282 = vector.broadcast %281 : vector<16x1xf32> to vector<16x16xf32>
    %283 = arith.subf %279, %282 : vector<16x16xf32>
    %284 = math.exp %283 : vector<16x16xf32>
    %cst_124 = arith.constant dense<0.000000e+00> : vector<16xf32>
    %285 = vector.multi_reduction <add>, %284, %cst_124 [1] : vector<16x16xf32> to vector<16xf32>
    %286 = vector.shape_cast %285 : vector<16xf32> to vector<16x1xf32>
    %287 = tpu.reciprocal %286 {approx = true} : vector<16x1xf32> -> vector<16x1xf32>
    %288 = vector.broadcast %287 : vector<16x1xf32> to vector<16x16xf32>
    %289 = arith.mulf %284, %288 : vector<16x16xf32>
    %cst_125 = arith.constant dense<0.000000e+00> : vector<16x32xf32>
    %290 = tpu.matmul %289, %272, %cst_125 {dimension_numbers = #tpu.dot_dimension_numbers<[1], [0], [0], [1], [0, 0, 1, 1], [], []>} : vector<16x16xf32>, vector<16x32xf32>, vector<16x32xf32> -> vector<16x32xf32>
    %291 = vector.extract_strided_slice %196 {offsets = [96, 0], sizes = [32, 128], strides = [1, 1]} : vector<128x128xf32> to vector<32x128xf32>
    %cst_126 = arith.constant dense<0.000000e+00> : vector<16x128xf32>
    %292 = tpu.matmul %290, %291, %cst_126 {dimension_numbers = #tpu.dot_dimension_numbers<[1], [0], [0], [1], [0, 0, 1, 1], [], []>} : vector<16x32xf32>, vector<32x128xf32>, vector<16x128xf32> -> vector<16x128xf32>
    %293 = arith.addf %269, %292 : vector<16x128xf32>
    %c1_127 = arith.constant 1 : index
    %c0_128 = arith.constant 0 : index
    %c0_129 = arith.constant 0 : index
    %294 = vector.load %arg5[%c1_127, %c0_128, %c0_129] : memref<2x1x128xf32, #tpu.memory_space<vmem>>, vector<1x1x128xf32>
    %295 = vector.shape_cast %294 : vector<1x1x128xf32> to vector<1x128xf32>
    %296 = vector.broadcast %295 : vector<1x128xf32> to vector<16x128xf32>
    %297 = arith.addf %293, %296 : vector<16x128xf32>
    %298 = arith.addf %184, %297 : vector<16x128xf32>
    %c1_130 = arith.constant 1 : index
    %c0_131 = arith.constant 0 : index
    %c0_132 = arith.constant 0 : index
    %299 = vector.load %arg6[%c1_130, %c0_131, %c0_132] : memref<2x1x128xf32, #tpu.memory_space<vmem>>, vector<1x1x128xf32>
    %300 = vector.shape_cast %299 : vector<1x1x128xf32> to vector<1x128xf32>
    %c1_133 = arith.constant 1 : index
    %c0_134 = arith.constant 0 : index
    %c0_135 = arith.constant 0 : index
    %301 = vector.load %arg7[%c1_133, %c0_134, %c0_135] : memref<2x1x128xf32, #tpu.memory_space<vmem>>, vector<1x1x128xf32>
    %302 = vector.shape_cast %301 : vector<1x1x128xf32> to vector<1x128xf32>
    %cst_136 = arith.constant dense<0.000000e+00> : vector<16xf32>
    %303 = vector.multi_reduction <add>, %298, %cst_136 [1] : vector<16x128xf32> to vector<16xf32>
    %304 = vector.shape_cast %303 : vector<16xf32> to vector<16x1xf32>
    %cst_137 = arith.constant 1.280000e+02 : f32
    %305 = vector.broadcast %cst_137 : f32 to vector<16x1xf32>
    %306 = arith.divf %304, %305 : vector<16x1xf32>
    %307 = vector.broadcast %306 : vector<16x1xf32> to vector<16x128xf32>
    %308 = arith.subf %298, %307 : vector<16x128xf32>
    %309 = arith.mulf %308, %308 : vector<16x128xf32>
    %cst_138 = arith.constant dense<0.000000e+00> : vector<16xf32>
    %310 = vector.multi_reduction <add>, %309, %cst_138 [1] : vector<16x128xf32> to vector<16xf32>
    %311 = vector.shape_cast %310 : vector<16xf32> to vector<16x1xf32>
    %cst_139 = arith.constant 1.280000e+02 : f32
    %312 = vector.broadcast %cst_139 : f32 to vector<16x1xf32>
    %313 = arith.divf %311, %312 : vector<16x1xf32>
    %314 = vector.broadcast %306 : vector<16x1xf32> to vector<16x128xf32>
    %315 = arith.subf %298, %314 : vector<16x128xf32>
    %cst_140 = arith.constant 9.99999974E-6 : f32
    %316 = vector.broadcast %cst_140 : f32 to vector<16x1xf32>
    %317 = arith.addf %313, %316 : vector<16x1xf32>
    %318 = math.rsqrt %317 : vector<16x1xf32>
    %319 = vector.broadcast %318 : vector<16x1xf32> to vector<16x128xf32>
    %320 = arith.mulf %315, %319 : vector<16x128xf32>
    %321 = vector.broadcast %300 : vector<1x128xf32> to vector<16x128xf32>
    %322 = arith.mulf %320, %321 : vector<16x128xf32>
    %323 = vector.broadcast %302 : vector<1x128xf32> to vector<16x128xf32>
    %324 = arith.addf %322, %323 : vector<16x128xf32>
    %c1_141 = arith.constant 1 : index
    %c0_142 = arith.constant 0 : index
    %c0_143 = arith.constant 0 : index
    %325 = vector.load %arg8[%c1_141, %c0_142, %c0_143] : memref<2x128x256xf32, #tpu.memory_space<vmem>>, vector<1x128x256xf32>
    %326 = vector.shape_cast %325 : vector<1x128x256xf32> to vector<128x256xf32>
    %cst_144 = arith.constant dense<0.000000e+00> : vector<16x256xf32>
    %327 = tpu.matmul %324, %326, %cst_144 {dimension_numbers = #tpu.dot_dimension_numbers<[1], [0], [0], [1], [0, 0, 1, 1], [], []>} : vector<16x128xf32>, vector<128x256xf32>, vector<16x256xf32> -> vector<16x256xf32>
    %c1_145 = arith.constant 1 : index
    %c0_146 = arith.constant 0 : index
    %c0_147 = arith.constant 0 : index
    %328 = vector.load %arg9[%c1_145, %c0_146, %c0_147] : memref<2x1x256xf32, #tpu.memory_space<vmem>>, vector<1x1x256xf32>
    %329 = vector.shape_cast %328 : vector<1x1x256xf32> to vector<1x256xf32>
    %330 = vector.broadcast %329 : vector<1x256xf32> to vector<16x256xf32>
    %331 = arith.addf %327, %330 : vector<16x256xf32>
    %cst_148 = arith.constant 0.000000e+00 : f32
    %332 = vector.broadcast %cst_148 : f32 to vector<16x256xf32>
    %333 = arith.maximumf %331, %332 : vector<16x256xf32>
    %c1_149 = arith.constant 1 : index
    %c0_150 = arith.constant 0 : index
    %c0_151 = arith.constant 0 : index
    %334 = vector.load %arg10[%c1_149, %c0_150, %c0_151] : memref<2x256x128xf32, #tpu.memory_space<vmem>>, vector<1x256x128xf32>
    %335 = vector.shape_cast %334 : vector<1x256x128xf32> to vector<256x128xf32>
    %cst_152 = arith.constant dense<0.000000e+00> : vector<16x128xf32>
    %336 = tpu.matmul %333, %335, %cst_152 {dimension_numbers = #tpu.dot_dimension_numbers<[1], [0], [0], [1], [0, 0, 1, 1], [], []>} : vector<16x256xf32>, vector<256x128xf32>, vector<16x128xf32> -> vector<16x128xf32>
    %c1_153 = arith.constant 1 : index
    %c0_154 = arith.constant 0 : index
    %c0_155 = arith.constant 0 : index
    %337 = vector.load %arg11[%c1_153, %c0_154, %c0_155] : memref<2x1x128xf32, #tpu.memory_space<vmem>>, vector<1x1x128xf32>
    %338 = vector.shape_cast %337 : vector<1x1x128xf32> to vector<1x128xf32>
    %339 = vector.broadcast %338 : vector<1x128xf32> to vector<16x128xf32>
    %340 = arith.addf %336, %339 : vector<16x128xf32>
    %341 = arith.addf %324, %340 : vector<16x128xf32>
    %c1_156 = arith.constant 1 : index
    %c0_157 = arith.constant 0 : index
    %c0_158 = arith.constant 0 : index
    %342 = vector.load %arg12[%c1_156, %c0_157, %c0_158] : memref<2x1x128xf32, #tpu.memory_space<vmem>>, vector<1x1x128xf32>
    %343 = vector.shape_cast %342 : vector<1x1x128xf32> to vector<1x128xf32>
    %c1_159 = arith.constant 1 : index
    %c0_160 = arith.constant 0 : index
    %c0_161 = arith.constant 0 : index
    %344 = vector.load %arg13[%c1_159, %c0_160, %c0_161] : memref<2x1x128xf32, #tpu.memory_space<vmem>>, vector<1x1x128xf32>
    %345 = vector.shape_cast %344 : vector<1x1x128xf32> to vector<1x128xf32>
    %cst_162 = arith.constant dense<0.000000e+00> : vector<16xf32>
    %346 = vector.multi_reduction <add>, %341, %cst_162 [1] : vector<16x128xf32> to vector<16xf32>
    %347 = vector.shape_cast %346 : vector<16xf32> to vector<16x1xf32>
    %cst_163 = arith.constant 1.280000e+02 : f32
    %348 = vector.broadcast %cst_163 : f32 to vector<16x1xf32>
    %349 = arith.divf %347, %348 : vector<16x1xf32>
    %350 = vector.broadcast %349 : vector<16x1xf32> to vector<16x128xf32>
    %351 = arith.subf %341, %350 : vector<16x128xf32>
    %352 = arith.mulf %351, %351 : vector<16x128xf32>
    %cst_164 = arith.constant dense<0.000000e+00> : vector<16xf32>
    %353 = vector.multi_reduction <add>, %352, %cst_164 [1] : vector<16x128xf32> to vector<16xf32>
    %354 = vector.shape_cast %353 : vector<16xf32> to vector<16x1xf32>
    %cst_165 = arith.constant 1.280000e+02 : f32
    %355 = vector.broadcast %cst_165 : f32 to vector<16x1xf32>
    %356 = arith.divf %354, %355 : vector<16x1xf32>
    %357 = vector.broadcast %349 : vector<16x1xf32> to vector<16x128xf32>
    %358 = arith.subf %341, %357 : vector<16x128xf32>
    %cst_166 = arith.constant 9.99999974E-6 : f32
    %359 = vector.broadcast %cst_166 : f32 to vector<16x1xf32>
    %360 = arith.addf %356, %359 : vector<16x1xf32>
    %361 = math.rsqrt %360 : vector<16x1xf32>
    %362 = vector.broadcast %361 : vector<16x1xf32> to vector<16x128xf32>
    %363 = arith.mulf %358, %362 : vector<16x128xf32>
    %364 = vector.broadcast %343 : vector<1x128xf32> to vector<16x128xf32>
    %365 = arith.mulf %363, %364 : vector<16x128xf32>
    %366 = vector.broadcast %345 : vector<1x128xf32> to vector<16x128xf32>
    %367 = arith.addf %365, %366 : vector<16x128xf32>
    %c0_167 = arith.constant 0 : index
    %c0_168 = arith.constant 0 : index
    %368 = vector.load %arg14[%c0_167, %c0_168] : memref<128x128xf32, #tpu.memory_space<vmem>>, vector<128x128xf32>
    %cst_169 = arith.constant dense<0.000000e+00> : vector<16x128xf32>
    %369 = tpu.matmul %367, %368, %cst_169 {dimension_numbers = #tpu.dot_dimension_numbers<[1], [0], [0], [1], [0, 0, 1, 1], [], []>} : vector<16x128xf32>, vector<128x128xf32>, vector<16x128xf32> -> vector<16x128xf32>
    %c0_170 = arith.constant 0 : index
    %c0_171 = arith.constant 0 : index
    %370 = vector.load %arg15[%c0_170, %c0_171] : memref<1x128xf32, #tpu.memory_space<vmem>>, vector<1x128xf32>
    %371 = vector.broadcast %370 : vector<1x128xf32> to vector<16x128xf32>
    %372 = arith.addf %369, %371 : vector<16x128xf32>
    %c0_172 = arith.constant 0 : index
    %c0_173 = arith.constant 0 : index
    %373 = vector.load %arg16[%c0_172, %c0_173] : memref<16x128xf32, #tpu.memory_space<vmem>>, vector<16x128xf32>
    tpu.vector_store %arg16[%c0_172, %c0_173], %372 {strides = array<i32>} : memref<16x128xf32, #tpu.memory_space<vmem>>, vector<16x128xf32>,
    return
  }
}

</mosaic_0001>

<bundles_post_ra>
// kernel: bert_qa_forward.1
= control target key start
LH: loop header
LB: loop body
LE: loop exit
PB: predicated region body
PF: predicated region fallthrough
CT: control target
= control target key end

     0   :  { %s2963_s0 = inlined_call_operand.vmem [shape: f32[16,128], index: 0, kind: input, shape index: {}]   ;;  %s2964_s1 = inlined_call_operand.vmem [shape: f32[16,16], index: 1, kind: input, shape index: {}]   ;;  %s2965_s2 = inlined_call_operand.hbm [shape: f32[2,128,384], index: 2, kind: input, shape index: {}]   ;;  %s2966_s3 = inlined_call_operand.vmem [shape: f32[2,1,384], index: 3, kind: input, shape index: {}]   ;;  %s2967_s4 = inlined_call_operand.vmem [shape: f32[2,128,128], index: 4, kind: input, shape index: {}]   ;;  %s2968_s5 = inlined_call_operand.vmem [shape: f32[2,1,128], index: 5, kind: input, shape index: {}]   ;;  %s2969_s6 = inlined_call_operand.vmem [shape: f32[2,1,128], index: 6, kind: input, shape index: {}]   ;;  %s2970_s7 = inlined_call_operand.vmem [shape: f32[2,1,128], index: 7, kind: input, shape index: {}]   ;;  %s2971_s8 = inlined_call_operand.hbm [shape: f32[2,128,256], index: 8, kind: input, shape index: {}]   ;;  %s2972_s9 = inlined_call_operand.vmem [shape: f32[2,1,256], index: 9, kind: input, shape index: {}]   ;;  %s2973_s10 = inlined_call_operand.hbm [shape: f32[2,256,128], index: 10, kind: input, shape index: {}]   ;;  %s2974_s11 = inlined_call_operand.vmem [shape: f32[2,1,128], index: 11, kind: input, shape index: {}]   ;;  %s2975_s12 = inlined_call_operand.vmem [shape: f32[2,1,128], index: 12, kind: input, shape index: {}]   ;;  %s2976_s13 = inlined_call_operand.vmem [shape: f32[2,1,128], index: 13, kind: input, shape index: {}]   ;;  %s2977_s14 = inlined_call_operand.vmem [shape: f32[128,128], index: 14, kind: input, shape index: {}]   ;;  %s2978_s15 = inlined_call_operand.vmem [shape: f32[1,128], index: 15, kind: input, shape index: {}]   ;;  %s2979_s16 = inlined_call_operand.vmem [shape: f32[16,128], index: 16, kind: output, shape index: {}]  }
   0x1   :  { %2981 = sst [smem:[#allocation9_spill]] %s2963_s0 }
   0x2   :  { %21 = vsyncpa [#allocation3], 0 }
   0x3   :  { %22 = vsyncpa [#allocation5], 0  ;;  %s54_s23 = sshll.u32 %s2971_s8, 4  ;;  %s2356_s24 = smov [#allocation4]   ;;  %s55_s23 = int_to_ptr.hbm [resolvable:$true] %s54_s23 }
   0x4   :  { %s56_s25 = sshll.u32 %s2356_s24, 4  ;;  %s31_s28 = sshll.u32 %s2965_s2, 4  ;;  %s57_s25 = int_to_ptr.vmem [resolvable:$true] %s56_s25  ;;  %s32_s28 = int_to_ptr.hbm [resolvable:$true] %s31_s28 }
   0x5   :  { %s2357_s29 = smov 256   ;;  %s2358_s30 = smov 16  }
   0x6   :  { %62 = dma.hbm_to_vmem [thread:$0]  %s55_s23, 8192, %s57_s25, [#allocation5], %s2357_s29, %s2357_s29, %s2358_s30  }
   0x7   :  { %s2359_s0 = smov [#allocation2]   ;;  %s2360_s18 = smov 384  }
   0x8   :  { %s33_s17 = sshll.u32 %s2359_s0, 4  ;;  %s2361_s19 = smov 24   ;;  %s34_s17 = int_to_ptr.vmem [resolvable:$true] %s33_s17 }
   0x9   :  { %39 = dma.hbm_to_vmem [thread:$0]  %s32_s28, 12288, %s34_s17, [#allocation3], %s2360_s18, %s2360_s18, %s2361_s19  }
   0xa   :  { %s69_s21 = sshll.u32 %s2973_s10, 4  ;;  %s2362_s22 = smov [#allocation6]   ;;  %s70_s21 = int_to_ptr.hbm [resolvable:$true] %s69_s21 }
   0xb   :  { %s71_s24 = sshll.u32 %s2362_s22, 4  ;;  %s2363_s26 = smov 128   ;;  %s72_s24 = int_to_ptr.vmem [resolvable:$true] %s71_s24 }
   0xc   :  { %s2364_s2 = smov 8  }
   0xd   :  { %77 = dma.hbm_to_vmem [thread:$0]  %s70_s21, 8192, %s72_s24, [#allocation5], %s2363_s26, %s2363_s26, %s2364_s2  }
   0xe   :  { %2352 = dma.done.wait [#allocation3], 12288  }
   0xf   :  { %2353 = vsyncadd [#allocation3], 4294955008 }
  0x10   :  { %2354 = dma.done.wait [#allocation5], 16384  }
  0x11   :  { %2355 = vsyncadd [#allocation5], 4294950912  ;;  %v150_v0 = vld [vmem:[#allocation2 + $0x170] sm:$0xff]  ;;  %v147_v1 = vld [vmem:[#allocation2 + $0x158] sm:$0xff]  ;;  %s2982_s25 = sld [smem:[#allocation9_spill]]  ;;  %vm245_vm0 = vcmask 261120  }
  0x12   :  { %183 = vmatpush.msra.mxu1 %v150_v0  ;;  %v144_v2 = vld [vmem:[#allocation2 + $0x140] sm:$0xff]  ;;  %v149_v3 = vld [vmem:[#allocation2 + $0x168] sm:$0xff]  ;;  %v146_v4 = vld [vmem:[#allocation2 + $0x150] sm:$0xff]  ;;  %s2365_s0 = smov 96   ;;  %s2366_s17 = smov 64   ;;  %vm287_vm2 = vcmask 130048  }
  0x13   :  { %160 = vmatpush.msra.mxu0 %v149_v3  ;;  %v141_v5 = vld [vmem:[#allocation2 + $0x128] sm:$0xff]  ;;  %v143_v6 = vld [vmem:[#allocation2 + $0x138] sm:$0xff]  ;;  %v138_v7 = vld [vmem:[#allocation2 + $0x110] sm:$0xff]  ;;  %s2367_s18 = smov 32  }
  0x14   :  { %184 = vmatpush.msra.mxu1 %v147_v1  ;;  %v140_v8 = vld [vmem:[#allocation2 + $0x120] sm:$0xff]  ;;  %v135_v9 = vld [vmem:[#allocation2 + $0xf8] sm:$0xff]  ;;  %v137_v10 = vld [vmem:[#allocation2 + $0x108] sm:$0xff] }
  0x15   :  { %161 = vmatpush.msra.mxu0 %v146_v4  ;;  %v132_v11 = vld [vmem:[#allocation2 + $0xe0] sm:$0xff]  ;;  %v134_v12 = vld [vmem:[#allocation2 + $0xf0] sm:$0xff]  ;;  %v151_v13 = vld [vmem:[#allocation2 + $0x178] sm:$0xff] }
  0x16   :  { %185 = vmatpush.msra.mxu1 %v144_v2  ;;  %v148_v14 = vld [vmem:[#allocation2 + $0x160] sm:$0xff]  ;;  %v129_v15 = vld [vmem:[#allocation2 + $0xc8] sm:$0xff]  ;;  %v131_v16 = vld [vmem:[#allocation2 + $0xd8] sm:$0xff]  ;;  %206 = vmatpush.msra.mxu2 %v151_v13 }
  0x17   :  { %162 = vmatpush.msra.mxu0 %v143_v6  ;;  %v145_v17 = vld [vmem:[#allocation2 + $0x148] sm:$0xff]  ;;  %v126_v18 = vld [vmem:[#allocation2 + $0xb0] sm:$0xff]  ;;  %v128_v19 = vld [vmem:[#allocation2 + $0xc0] sm:$0xff] }
  0x18   :  { %186 = vmatpush.msra.mxu1 %v141_v5  ;;  %207 = vmatpush.msra.mxu2 %v148_v14  ;;  %v123_v20 = vld [vmem:[#allocation2 + $0x98] sm:$0xff]  ;;  %v125_v21 = vld [vmem:[#allocation2 + $0xa8] sm:$0xff]  ;;  %v142_v22 = vld [vmem:[#allocation2 + $0x130] sm:$0xff] }
  0x19   :  { %163 = vmatpush.msra.mxu0 %v140_v8  ;;  %v120_v23 = vld [vmem:[#allocation2 + $0x80] sm:$0xff]  ;;  %v122_v24 = vld [vmem:[#allocation2 + $0x90] sm:$0xff]  ;;  %v139_v25 = vld [vmem:[#allocation2 + $0x118] sm:$0xff] }
  0x1a   :  { %187 = vmatpush.msra.mxu1 %v138_v7  ;;  %208 = vmatpush.msra.mxu2 %v145_v17  ;;  %v117_v26 = vld [vmem:[#allocation2 + $0x68] sm:$0xff]  ;;  %v136_v27 = vld [vmem:[#allocation2 + $0x100] sm:$0xff]  ;;  %v119_v28 = vld [vmem:[#allocation2 + $0x78] sm:$0xff] }
  0x1b   :  { %164 = vmatpush.msra.mxu0 %v137_v10  ;;  %v133_v29 = vld [vmem:[#allocation2 + $0xe8] sm:$0xff]  ;;  %v114_v30 = vld [vmem:[#allocation2 + $0x50] sm:$0xff]  ;;  %v116_v31 = vld [vmem:[#allocation2 + $0x60] sm:$0xff] }
  0x1c   :  { %188 = vmatpush.msra.mxu1 %v135_v9  ;;  %209 = vmatpush.msra.mxu2 %v142_v22  ;;  %v130_v32 = vld [vmem:[#allocation2 + $0xd0] sm:$0xff]  ;;  %v111_v33 = vld [vmem:[#allocation2 + $0x38] sm:$0xff]  ;;  %v113_v34 = vld [vmem:[#allocation2 + $0x48] sm:$0xff] }
  0x1d   :  { %165 = vmatpush.msra.mxu0 %v134_v12  ;;  %v127_v35 = vld [vmem:[#allocation2 + $0xb8] sm:$0xff]  ;;  %v108_v36 = vld [vmem:[#allocation2 + $0x20] sm:$0xff]  ;;  %v110_v37 = vld [vmem:[#allocation2 + $0x30] sm:$0xff] }
  0x1e   :  { %189 = vmatpush.msra.mxu1 %v132_v11  ;;  %210 = vmatpush.msra.mxu2 %v139_v25  ;;  %v124_v38 = vld [vmem:[#allocation2 + $0xa0] sm:$0xff]  ;;  %v105_v39 = vld [vmem:[#allocation2 + $0x8] sm:$0xff]  ;;  %v107_v40 = vld [vmem:[#allocation2 + $0x18] sm:$0xff] }
  0x1f   :  { %166 = vmatpush.msra.mxu0 %v131_v16  ;;  %v2466_v41 = vld [vmem:[%s2982_s25] sm:$0xff]  ;;  %v121_v42 = vld [vmem:[#allocation2 + $0x88] sm:$0xff]  ;;  %v118_v44 = vld [vmem:[#allocation2 + $0x70] sm:$0xff] }
  0x20   :  { %190 = vmatpush.msra.mxu1 %v129_v15  ;;  %211 = vmatpush.msra.mxu2 %v136_v27  ;;  %v104_v43 = vld [vmem:[#allocation2] sm:$0xff]  ;;  %v115_v45 = vld [vmem:[#allocation2 + $0x58] sm:$0xff]  ;;  %v2473_v47 = vld [vmem:[%s2982_s25 + $0x8] sm:$0xff] }
  0x21   :  { %167 = vmatpush.msra.mxu0 %v128_v19  ;;  %v112_v46 = vld [vmem:[#allocation2 + $0x40] sm:$0xff]  ;;  %v109_v48 = vld [vmem:[#allocation2 + $0x28] sm:$0xff]  ;;  %v106_v49 = vld [vmem:[#allocation2 + $0x10] sm:$0xff] }
  0x22   :  { %191 = vmatpush.msra.mxu1 %v126_v18  ;;  %212 = vmatpush.msra.mxu2 %v133_v29  ;;  %v152_v52 = vld [vmem:[%s2966_s3] sm:$0x7]  ;;  %v2518_v8 = vld [vmem:[%s2964_s1 + $0x8] sm:$0xff]  ;;  %v231_v27 = vld [vmem:[%s2967_s4 + $0x10] sm:$0xff] }
  0x23   :  { %168 = vmatpush.msra.mxu0 %v125_v21  ;;  %v155_v53 = vperm.slane %v152_v52, 1  ;;  %v154_v56 = vperm.slane %v152_v52, 0  ;;  %v156_v62 = vperm.slane %v152_v52, 2  ;;  %v2512_v4 = vld [vmem:[%s2964_s1] sm:$0xff]  ;;  %vm284_vm3 = vcmp.gt.f32.partialorder %v2518_v8, 0.0 }
  0x24   :  { %192 = vmatpush.msra.mxu1 %v123_v20  ;;  %213 = vmatpush.msra.mxu2 %v130_v32  ;;  %vm283_vm1 = vcmp.gt.f32.partialorder %v2512_v4, 0.0  ;;  %v229_v29 = vld [vmem:[%s2967_s4] sm:$0xff] }
  0x25   :  { %169 = vmatpush.msra.mxu0 %v122_v24 }
  0x26   :  { %193 = vmatpush.msra.mxu1 %v120_v23  ;;  %214 = vmatpush.msra.mxu2 %v127_v35 }
  0x27   :  { %170 = vmatpush.msra.mxu0 %v119_v28  ;;  %v230_v28 = vld [vmem:[%s2967_s4 + $0x8] sm:$0xff] }
  0x28   :  { %194 = vmatpush.msra.mxu1 %v117_v26  ;;  %215 = vmatpush.msra.mxu2 %v124_v38  ;;  %v232_v26 = vld [vmem:[%s2967_s4 + $0x18] sm:$0xff] }
  0x29   :  { %171 = vmatpush.msra.mxu0 %v116_v31 }
  0x2a   :  { %195 = vmatpush.msra.mxu1 %v114_v30  ;;  %216 = vmatpush.msra.mxu2 %v121_v42 }
  0x2b   :  { %172 = vmatpush.msra.mxu0 %v113_v34 }
  0x2c   :  { %196 = vmatpush.msra.mxu1 %v111_v33  ;;  %217 = vmatpush.msra.mxu2 %v118_v44 }
  0x2d   :  { %173 = vmatpush.msra.mxu0 %v110_v37 }
  0x2e   :  { %197 = vmatpush.msra.mxu1 %v108_v36  ;;  %218 = vmatpush.msra.mxu2 %v115_v45 }
  0x2f   :  { %174 = vmatpush.msra.mxu0 %v107_v40 }
  0x30   :  { %198 = vmatpush.msra.mxu1 %v105_v39  ;;  %219 = vmatpush.msra.mxu2 %v112_v46 }
  0x31   :  { %199 = vmatmul.f32.vlgmr.msra.gmra.mxu1 %v2466_v41  ;;  %175 = vmatpush.msra.mxu0 %v104_v43 }
  0x32   :  { %176 = vmatmul.f32.vlgmr.msra.gmra.mxu0 %v2466_v41  ;;  %220 = vmatpush.msra.mxu2 %v109_v48 }
  0x34   :  { %221 = vmatpush.msra.mxu2 %v106_v49 }
  0x35   :  { %222 = vmatmul.f32.vlgmr.msra.gmra.mxu2 %v2466_v41 }
  0x36   :  { %488 = vmatpush.msrb.mxu2 %v232_v26 }
  0x38   :  { %489 = vmatpush.msrb.mxu2 %v231_v27 }
  0x39   :  { %202 = vmatmul.f32.gmra.mxu1 %v2473_v47 }
  0x3a   :  { %179 = vmatmul.f32.gmra.mxu0 %v2473_v47  ;;  %490 = vmatpush.msrb.mxu2 %v230_v28 }
  0x3c   :  { %491 = vmatpush.msrb.mxu2 %v229_v29 }
  0x3d   :  { %225 = vmatmul.f32.gmra.mxu2 %v2473_v47 }
  0xae   :  { %v200_v50 = vpop.f32.mrf.mxu1 }
  0xaf   :  { %v177_v51 = vpop.f32.mrf.mxu0  ;;  %v201_v58 = vadd.f32 %v200_v50, %v155_v53 }
  0xb0   :  { %v178_v59 = vadd.f32 %v177_v51, %v154_v56 }
  0xb6   :  { %v203_v54 = vpop.f32.mrf.mxu1 }
  0xb7   :  { %v2482_v55 = vadd.f32 %v203_v54, %v155_v53  ;;  %v180_v57 = vpop.f32.mrf.mxu0 }
  0xb8   :  { %v181_v60 = vadd.f32 %v180_v57, %v154_v56  ;;  %v223_v61 = vpop.f32.mrf.mxu2 }
  0xb9   :  { %345 = vrot.lane.b32.xlu2 %v2482_v55, %s2365_s0  ;;  %2052 = vmatpush.xpose.msk.msrb.mxu0 %vm245_vm0, %v2482_v55  ;;  %v2498_v0 = vadd.f32 %v223_v61, %v156_v62 }
  0xba   :  { %2140 = vmatpush.xpose.msk.msrb.mxu1 %vm245_vm0, %v2482_v55 }
  0xbd   :  { %2053 = vmatpush.xpose.msk.msrb.mxu0 %vm245_vm0, %v201_v58 }
  0xbe   :  { %2141 = vmatpush.xpose.msk.msrb.mxu1 %vm245_vm0, %v201_v58 }
  0xc0   :  { %2054 = vmatmul.msk.f32.vlgmr.msrb.gmra.mxu0 %vm245_vm0, %v178_v59  ;;  %v226_v63 = vpop.f32.mrf.mxu2 }
  0xc1   :  { %343 = vrot.lane.b32.xlu2 %v201_v58, %s2365_s0  ;;  %2055 = vmatmul.msk.f32.vlgmr.msrb.gmra.mxu1 %vm245_vm0, %v181_v60  ;;  %v2500_v1 = vadd.f32 %v226_v63, %v156_v62 }
  0xc3   :  { %330 = vmatpush.msra.mxu3 %v2500_v1  ;;  %v2155_v29 = vpack.i.bf16 %v2498_v0, %v2500_v1 }
  0xc5   :  { %331 = vmatpush.msra.mxu3 %v2498_v0 }
  0xc9   :  { %341 = vrot.lane.b32.xlu2 %v181_v60, %s2365_s0 }
  0xd1   :  { %505 = vrot.lane.b32.xlu2 %v2482_v55, %s2366_s17 }
  0xd9   :  { %634 = vrot.lane.b32.xlu2 %v201_v58, %s2367_s18 }
  0xe1   :  { %503 = vrot.lane.b32.xlu2 %v201_v58, %s2366_s17 }
  0xe9   :  { %501 = vrot.lane.b32.xlu2 %v181_v60, %s2366_s17 }
 0x113   :  { %v346_v2 = vpop.permute.xlu2 %345 }
 0x114   :  { %2058 = vmatpush.xpose.msk.msrb.mxu3 %vm245_vm0, %v346_v2 }
 0x11b   :  { %v344_v3 = vpop.permute.xlu2 %343 }
 0x11c   :  { %2059 = vmatpush.xpose.msk.msrb.mxu3 %vm245_vm0, %v344_v3 }
 0x123   :  { %v342_v24 = vpop.permute.xlu2 %341 }
 0x12b   :  { %v506_v25 = vpop.permute.xlu2 %505 }
 0x133   :  { %v635_v31 = vpop.permute.xlu2 %634 }
 0x13b   :  { %v504_v35 = vpop.permute.xlu2 %503 }
 0x13d   :  { %v275_v5 = vpop.f32.mrf.mxu0 }
 0x13e   :  { %v281_v6 = vmul.f32 0.17677669, %v275_v5  ;;  %v278_v7 = vpop.f32.mrf.mxu1 }
 0x13f   :  { %v282_v10 = vmul.f32 0.17677669, %v278_v7 }
 0x140   :  { %v285_v9 = vsel %vm283_vm1, %v281_v6, -1e+09 }
 0x141   :  { %v288_v11 = vsel %vm287_vm2, %v285_v9, -inf  ;;  %v286_v12 = vsel %vm284_vm3, %v282_v10, -1e+09 }
 0x142   :  { %289 = vmax.xlane.f32.xlu0 %v288_v11  ;;  %v291_v13 = vsel %vm287_vm2, %v286_v12, -inf }
 0x143   :  { %v502_v42 = vpop.permute.xlu2 %501 }
 0x14a   :  { %292 = vmax.xlane.f32.xlu0 %v291_v13 }
 0x15e   :  { %339 = vrot.lane.b32.xlu0 %v178_v59, %s2365_s0 }
 0x166   :  { %630 = vrot.lane.b32.xlu0 %v178_v59, %s2367_s18 }
 0x16e   :  { %632 = vrot.lane.b32.xlu0 %v181_v60, %s2367_s18 }
 0x1b5   :  { %v290_v14 = vpop.xlane.xlu0 %289 }
 0x1b6   :  { %v294_v15 = vsub.f32 %v285_v9, %v290_v14 }
 0x1b8   :  { %v296_v16 = vmul.f32 1.442695, %v294_v15 }
 0x1ba   :  { %2198 = vpow2.f32 %v296_v16 }
 0x1bd   :  { %v293_v17 = vpop.xlane.xlu0 %292 }
 0x1be   :  { %v295_v18 = vsub.f32 %v286_v12, %v293_v17 }
 0x1c0   :  { %v2199_v19 = vpop.eup %2198  ;;  %v298_v20 = vmul.f32 1.442695, %v295_v18 }
 0x1c1   :  { %v300_v21 = vsel %vm287_vm2, %v2199_v19, 0.0 }
 0x1c2   :  { %2200 = vpow2.f32 %v298_v20  ;;  %301 = vadd.xlane.f32.xlu1 %v300_v21 }
 0x1c8   :  { %v2201_v22 = vpop.eup %2200 }
 0x1c9   :  { %v303_v23 = vsel %vm287_vm2, %v2201_v22, 0.0 }
 0x1ca   :  { %304 = vadd.xlane.f32.xlu1 %v303_v23 }
 0x1d0   :  { %v340_v38 = vpop.permute.xlu0 %339 }
 0x1d8   :  { %v631_v45 = vpop.permute.xlu0 %630 }
 0x1e0   :  { %v633_v51 = vpop.permute.xlu0 %632 }
 0x1e3   :  { %636 = vrot.lane.b32.xlu1 %v2482_v55, %s2367_s18 }
 0x1eb   :  { %499 = vrot.lane.b32.xlu1 %v178_v59, %s2366_s17 }
 0x235   :  { %v302_v30 = vpop.xlane.xlu1 %301 }
 0x236   :  { %2202 = vrcp.f32 %v302_v30 }
 0x23c   :  { %v2203_v32 = vpop.eup %2202 }
 0x23d   :  { %v305_v33 = vpop.xlane.xlu1 %304  ;;  %v308_v34 = vmul.f32 %v2203_v32, %v2199_v19 }
 0x23e   :  { %2204 = vrcp.f32 %v305_v33 }
 0x23f   :  { %2056 = vmatmul.msk.f32.vlgmr.msra.gmra.mxu3 %vm287_vm2, %v308_v34 }
 0x240   :  { %2068 = vmatpush.xpose.msk.msra.mxu3 %vm245_vm0, %v506_v25 }
 0x244   :  { %v2205_v36 = vpop.eup %2204  ;;  %2069 = vmatpush.xpose.msk.msra.mxu3 %vm245_vm0, %v504_v35 }
 0x245   :  { %v309_v37 = vmul.f32 %v2205_v36, %v2201_v22 }
 0x247   :  { %2057 = vmatmul.msk.f32.gmra.mxu3 %vm287_vm2, %v309_v37 }
 0x24f   :  { %2060 = vmatmul.msk.f32.vlgmr.msrb.gmra.mxu3 %vm245_vm0, %v340_v38 }
 0x255   :  { %v637_v39 = vpop.permute.xlu1 %636 }
 0x256   :  { %2076 = vmatpush.xpose.msk.msra.mxu2 %vm245_vm0, %v637_v39 }
 0x257   :  { %2061 = vmatmul.msk.f32.gmra.mxu3 %vm245_vm0, %v342_v24 }
 0x25a   :  { %2077 = vmatpush.xpose.msk.msra.mxu2 %vm245_vm0, %v635_v31 }
 0x25d   :  { %v500_v40 = vpop.permute.xlu1 %499 }
 0x25f   :  { %2070 = vmatmul.msk.f32.vlgmr.msra.gmra.mxu3 %vm245_vm0, %v500_v40 }
 0x267   :  { %2071 = vmatmul.msk.f32.gmra.mxu3 %vm245_vm0, %v502_v42 }
 0x2c2   :  { %v333_v43 = vpop.f32.mrf.mxu3 }
 0x2c3   :  { %2066 = vmatmul.msk.f32.vlgmr.msrb.gmra.mxu2 %vm245_vm0, %v333_v43 }
 0x2ca   :  { %v336_v44 = vpop.f32.mrf.mxu3 }
 0x2cb   :  { %2067 = vmatmul.msk.f32.gmra.mxu2 %vm245_vm0, %v336_v44 }
 0x2d2   :  { %v372_v46 = vpop.f32.mrf.mxu3 }
 0x2d3   :  { %v378_v48 = vmul.f32 0.17677669, %v372_v46  ;;  %2078 = vmatmul.msk.f32.vlgmr.msra.gmra.mxu2 %vm245_vm0, %v631_v45 }
 0x2d5   :  { %v380_v49 = vsel %vm283_vm1, %v378_v48, -1e+09 }
 0x2d6   :  { %v382_v50 = vsel %vm287_vm2, %v380_v49, -inf }
 0x2d7   :  { %383 = vmax.xlane.f32.xlu1 %v382_v50 }
 0x2da   :  { %v375_v52 = vpop.f32.mrf.mxu3 }
 0x2db   :  { %v379_v53 = vmul.f32 0.17677669, %v375_v52  ;;  %2079 = vmatmul.msk.f32.gmra.mxu2 %vm245_vm0, %v633_v51 }
 0x2dd   :  { %v381_v54 = vsel %vm284_vm3, %v379_v53, -1e+09 }
 0x2de   :  { %v385_v55 = vsel %vm287_vm2, %v381_v54, -inf }
 0x2df   :  { %386 = vmax.xlane.f32.xlu0 %v385_v55 }
 0x2e2   :  { %v532_v56 = vpop.f32.mrf.mxu3 }
 0x2e3   :  { %v538_v57 = vmul.f32 0.17677669, %v532_v56 }
 0x2e5   :  { %v540_v58 = vsel %vm283_vm1, %v538_v57, -1e+09 }
 0x2e6   :  { %v542_v59 = vsel %vm287_vm2, %v540_v58, -inf }
 0x2e7   :  { %543 = vmax.xlane.f32.xlu1 %v542_v59 }
 0x2ea   :  { %v535_v10 = vpop.f32.mrf.mxu3 }
 0x2eb   :  { %v539_v14 = vmul.f32 0.17677669, %v535_v10  ;;  %v237_v10 = vld [vmem:[%s2967_s4 + $0x40] sm:$0xff] }
 0x2ed   :  { %v541_v19 = vsel %vm284_vm3, %v539_v14, -1e+09 }
 0x2ee   :  { %v545_v22 = vsel %vm287_vm2, %v541_v19, -inf }
 0x346   :  { %v2570_v60 = vpop.f32.mrf.mxu2 }
 0x34a   :  { %v384_v61 = vpop.xlane.xlu1 %383 }
 0x34b   :  { %v388_v62 = vsub.f32 %v380_v49, %v384_v61  ;;  %v236_v61 = vld [vmem:[%s2967_s4 + $0x38] sm:$0xff] }
 0x34c   :  { %459 = vmatpush.msra.mxu1 %v236_v61 }
 0x34d   :  { %v390_v63 = vmul.f32 1.442695, %v388_v62  ;;  %v235_v62 = vld [vmem:[%s2967_s4 + $0x30] sm:$0xff] }
 0x34e   :  { %v2572_v2 = vpop.f32.mrf.mxu2  ;;  %460 = vmatpush.msra.mxu1 %v235_v62 }
 0x34f   :  { %2206 = vpow2.f32 %v390_v63  ;;  %v234_v63 = vld [vmem:[%s2967_s4 + $0x28] sm:$0xff] }
 0x350   :  { %461 = vmatpush.msra.mxu1 %v234_v63 }
 0x352   :  { %v387_v5 = vpop.xlane.xlu0 %386 }
 0x353   :  { %v389_v11 = vsub.f32 %v381_v54, %v387_v5  ;;  %v240_v5 = vld [vmem:[%s2967_s4 + $0x58] sm:$0xff] }
 0x355   :  { %v2574_v3 = vpop.eup %2206  ;;  %v392_v15 = vmul.f32 1.442695, %v389_v11 }
 0x356   :  { %v663_v6 = vpop.f32.mrf.mxu2  ;;  %v394_v7 = vsel %vm287_vm2, %v2574_v3, 0.0 }
 0x357   :  { %v669_v9 = vmul.f32 0.17677669, %v663_v6  ;;  %395 = vadd.xlane.f32.xlu1 %v394_v7  ;;  %2208 = vpow2.f32 %v392_v15  ;;  %v239_v6 = vld [vmem:[%s2967_s4 + $0x50] sm:$0xff] }
 0x359   :  { %v671_v12 = vsel %vm283_vm1, %v669_v9, -1e+09  ;;  %v238_v9 = vld [vmem:[%s2967_s4 + $0x48] sm:$0xff] }
 0x35a   :  { %v673_v13 = vsel %vm287_vm2, %v671_v12, -inf  ;;  %v544_v16 = vpop.xlane.xlu1 %543 }
 0x35b   :  { %674 = vmax.xlane.f32.xlu2 %v673_v13  ;;  %v548_v20 = vsub.f32 %v540_v58, %v544_v16 }
 0x35d   :  { %v550_v24 = vmul.f32 1.442695, %v548_v20  ;;  %v2209_v25 = vpop.eup %2208 }
 0x35e   :  { %v666_v17 = vpop.f32.mrf.mxu2  ;;  %v397_v26 = vsel %vm287_vm2, %v2209_v25, 0.0 }
 0x35f   :  { %v670_v18 = vmul.f32 0.17677669, %v666_v17  ;;  %2210 = vpow2.f32 %v550_v24 }
 0x361   :  { %v672_v21 = vsel %vm284_vm3, %v670_v18, -1e+09 }
 0x362   :  { %v676_v23 = vsel %vm287_vm2, %v672_v21, -inf }
 0x363   :  { %546 = vmax.xlane.f32.xlu2 %v545_v22  ;;  %677 = vmax.xlane.f32.xlu0 %v676_v23 }
 0x365   :  { %v2211_v27 = vpop.eup %2210 }
 0x366   :  { %v554_v28 = vsel %vm287_vm2, %v2211_v27, 0.0 }
 0x36b   :  { %398 = vadd.xlane.f32.xlu2 %v397_v26  ;;  %v243_v26 = vld [vmem:[%s2967_s4 + $0x70] sm:$0xff] }
 0x373   :  { %555 = vadd.xlane.f32.xlu2 %v554_v28  ;;  %v241_v28 = vld [vmem:[%s2967_s4 + $0x60] sm:$0xff] }
 0x377   :  { %2156 = vrot.lane.b32.xlu0 %v2155_v29, %s2365_s0 }
 0x37f   :  { %2166 = vrot.lane.b32.xlu0 %v2155_v29, %s2366_s17 }
 0x3ca   :  { %v396_v1 = vpop.xlane.xlu1 %395 }
 0x3ce   :  { %v675_v30 = vpop.xlane.xlu2 %674 }
 0x3cf   :  { %v679_v31 = vsub.f32 %v671_v12, %v675_v30 }
 0x3d1   :  { %v681_v32 = vmul.f32 1.442695, %v679_v31 }
 0x3d3   :  { %2212 = vpow2.f32 %v681_v32 }
 0x3d6   :  { %v678_v33 = vpop.xlane.xlu0 %677  ;;  %v547_v34 = vpop.xlane.xlu2 %546 }
 0x3d7   :  { %v680_v35 = vsub.f32 %v672_v21, %v678_v33  ;;  %v549_v38 = vsub.f32 %v541_v19, %v547_v34 }
 0x3d9   :  { %v2593_v36 = vpop.eup %2212  ;;  %v683_v37 = vmul.f32 1.442695, %v680_v35  ;;  %v552_v0 = vmul.f32 1.442695, %v549_v38 }
 0x3da   :  { %v685_v39 = vsel %vm287_vm2, %v2593_v36, 0.0 }
 0x3db   :  { %686 = vadd.xlane.f32.xlu1 %v685_v39  ;;  %2214 = vpow2.f32 %v683_v37  ;;  %v2185_v37 = vld [vmem:[%s2968_s5] ss:$0 sm:$0xff] }
 0x3dc   :  { %2216 = vpow2.f32 %v552_v0 }
 0x3dd   :  { %2218 = vrcp.f32 %v396_v1 }
 0x3de   :  { %v399_v43 = vpop.xlane.xlu2 %398 }
 0x3df   :  { %2220 = vrcp.f32 %v399_v43 }
 0x3e1   :  { %v2597_v40 = vpop.eup %2214 }
 0x3e2   :  { %v688_v42 = vsel %vm287_vm2, %v2597_v40, 0.0  ;;  %v2217_v44 = vpop.eup %2216 }
 0x3e3   :  { %689 = vadd.xlane.f32.xlu2 %v688_v42  ;;  %v2219_v46 = vpop.eup %2218  ;;  %v557_v49 = vsel %vm287_vm2, %v2217_v44, 0.0 }
 0x3e4   :  { %v402_v51 = vmul.f32 %v2219_v46, %v2574_v3  ;;  %v233_v3 = vld [vmem:[%s2967_s4 + $0x20] sm:$0xff] }
 0x3e5   :  { %v2221_v54 = vpop.eup %2220  ;;  %462 = vmatpush.msra.mxu1 %v233_v3 }
 0x3e6   :  { %v556_v52 = vpop.xlane.xlu2 %555  ;;  %v403_v57 = vmul.f32 %v2221_v54, %v2209_v25  ;;  %v244_v25 = vld [vmem:[%s2967_s4 + $0x78] sm:$0xff] }
 0x3e7   :  { %2222 = vrcp.f32 %v556_v52  ;;  %617 = vmatpush.msrb.mxu1 %v240_v5  ;;  %v859_v52 = vld [vmem:[#allocation4 + $0xf8] sm:$0xff]  ;;  %v854_v5 = vld [vmem:[#allocation4 + $0xd0] sm:$0xff] }
 0x3e8   :  { %889 = vmatpush.msrb.mxu2 %v859_v52 }
 0x3e9   :  { %v2157_v45 = vpop.permute.xlu0 %2156  ;;  %618 = vmatpush.msrb.mxu1 %v239_v6  ;;  %v855_v6 = vld [vmem:[#allocation4 + $0xd8] sm:$0xff] }
 0x3ea   :  { %v2158_v48 = vunpack.i.l.bf16 %v2157_v45  ;;  %v2159_v50 = vunpack.i.h.bf16 %v2157_v45 }
 0x3eb   :  { %558 = vadd.xlane.f32.xlu2 %v557_v49  ;;  %619 = vmatpush.msrb.mxu1 %v238_v9  ;;  %v853_v9 = vld [vmem:[#allocation4 + $0xc8] sm:$0xff] }
 0x3ec   :  { %432 = vmatpush.msra.mxu0 %v2158_v48  ;;  %v2368_v48 = vmov 128.0  }
 0x3ed   :  { %v2223_v58 = vpop.eup %2222  ;;  %620 = vmatpush.msrb.mxu1 %v237_v10  ;;  %v850_v10 = vld [vmem:[#allocation4 + $0xb0] sm:$0xff] }
 0x3ee   :  { %433 = vmatpush.msra.mxu0 %v2159_v50  ;;  %v562_v59 = vmul.f32 %v2223_v58, %v2211_v27  ;;  %v242_v27 = vld [vmem:[%s2967_s4 + $0x68] sm:$0xff] }
 0x3ef   :  { %2062 = vmatmul.msk.f32.vlgmr.msra.gmra.mxu0 %vm287_vm2, %v402_v51  ;;  %v858_v51 = vld [vmem:[#allocation4 + $0xf0] sm:$0xff] }
 0x3f1   :  { %v2167_v53 = vpop.permute.xlu0 %2166 }
 0x3f2   :  { %v2168_v55 = vunpack.i.l.bf16 %v2167_v53  ;;  %v2169_v56 = vunpack.i.h.bf16 %v2167_v53  ;;  %v856_v53 = vld [vmem:[#allocation4 + $0xe0] sm:$0xff] }
 0x3f4   :  { %2161 = vrot.lane.b32.xlu1 %v2155_v29, %s2367_s18  ;;  %590 = vmatpush.msrb.mxu0 %v2168_v55 }
 0x3f6   :  { %591 = vmatpush.msrb.mxu0 %v2169_v56 }
 0x3f7   :  { %2063 = vmatmul.msk.f32.gmra.mxu0 %vm287_vm2, %v403_v57 }
 0x3f8   :  { %748 = vmatpush.msra.mxu0 %v244_v25  ;;  %v837_v25 = vld [vmem:[#allocation4 + $0x48] sm:$0xff] }
 0x3fa   :  { %749 = vmatpush.msra.mxu0 %v243_v26  ;;  %v834_v26 = vld [vmem:[#allocation4 + $0x30] sm:$0xff] }
 0x3fc   :  { %750 = vmatpush.msra.mxu0 %v242_v27  ;;  %v835_v27 = vld [vmem:[#allocation4 + $0x38] sm:$0xff] }
 0x3fe   :  { %751 = vmatpush.msra.mxu0 %v241_v28  ;;  %v832_v28 = vld [vmem:[#allocation4 + $0x20] sm:$0xff] }
 0x3ff   :  { %2072 = vmatmul.msk.f32.vlgmr.msrb.gmra.mxu0 %vm287_vm2, %v562_v59 }
 0x44e   :  { %v687_v11 = vpop.xlane.xlu1 %686 }
 0x456   :  { %v690_v7 = vpop.xlane.xlu2 %689 }
 0x45e   :  { %v559_v12 = vpop.xlane.xlu2 %558 }
 0x45f   :  { %2224 = vrcp.f32 %v559_v12  ;;  %v848_v12 = vld [vmem:[#allocation4 + $0xa0] sm:$0xff] }
 0x460   :  { %2226 = vrcp.f32 %v687_v11  ;;  %v851_v11 = vld [vmem:[#allocation4 + $0xb8] sm:$0xff] }
 0x461   :  { %2228 = vrcp.f32 %v690_v7  ;;  %v852_v7 = vld [vmem:[#allocation4 + $0xc0] sm:$0xff] }
 0x462   :  { %2230 = vrcp.f32 %v2368_v48  ;;  %v927_v48 = vld [vmem:[#allocation6 + $0x58] sm:$0xff] }
 0x465   :  { %v2225_v13 = vpop.eup %2224 }
 0x466   :  { %v2162_v14 = vpop.permute.xlu1 %2161  ;;  %v2227_v15 = vpop.eup %2226  ;;  %v563_v17 = vmul.f32 %v2225_v13, %v2217_v44  ;;  %v849_v13 = vld [vmem:[#allocation4 + $0xa8] sm:$0xff] }
 0x467   :  { %v2163_v16 = vunpack.i.l.bf16 %v2162_v14  ;;  %v2164_v18 = vunpack.i.h.bf16 %v2162_v14  ;;  %v693_v19 = vmul.f32 %v2227_v15, %v2593_v36  ;;  %v2229_v21 = vpop.eup %2228  ;;  %v846_v14 = vld [vmem:[#allocation4 + $0x90] sm:$0xff]  ;;  %v847_v15 = vld [vmem:[#allocation4 + $0x98] sm:$0xff] }
 0x468   :  { %2073 = vmatmul.msk.f32.gmra.mxu0 %vm287_vm2, %v563_v17  ;;  %v694_v22 = vmul.f32 %v2229_v21, %v2597_v40  ;;  %v2231_v49 = vpop.eup %2230  ;;  %v845_v17 = vld [vmem:[#allocation4 + $0x88] sm:$0xff] }
 0x469   :  { %721 = vmatpush.msrb.mxu3 %v2163_v16  ;;  %v776_v50 = vmul.f32 128.0, %v2231_v49  ;;  %vm780_vm4 = vweird.f32 %v2231_v49  ;;  %v844_v16 = vld [vmem:[#allocation4 + $0x80] sm:$0xff]  ;;  %v841_v21 = vld [vmem:[#allocation4 + $0x68] sm:$0xff] }
 0x46b   :  { %722 = vmatpush.msrb.mxu3 %v2164_v18  ;;  %v777_v54 = vsub.f32 1.0, %v776_v50  ;;  %v842_v18 = vld [vmem:[#allocation4 + $0x70] sm:$0xff]  ;;  %v943_v50 = vld [vmem:[#allocation6 + $0xd8] sm:$0xff] }
 0x46c   :  { %v435_v20 = vpop.f32.mrf.mxu0  ;;  %2080 = vmatmul.msk.f32.vlgmr.msrb.gmra.mxu3 %vm287_vm2, %v693_v19  ;;  %v843_v19 = vld [vmem:[#allocation4 + $0x78] sm:$0xff] }
 0x46d   :  { %2064 = vmatmul.msk.f32.vlgmr.msra.gmra.mxu1 %vm245_vm0, %v435_v20  ;;  %v840_v20 = vld [vmem:[#allocation4 + $0x60] sm:$0xff] }
 0x46e   :  { %866 = vmatpush.msra.mxu1 %v858_v51  ;;  %v926_v51 = vld [vmem:[#allocation6 + $0x50] sm:$0xff] }
 0x470   :  { %867 = vmatpush.msra.mxu1 %v856_v53  ;;  %v942_v53 = vld [vmem:[#allocation6 + $0xd0] sm:$0xff] }
 0x472   :  { %868 = vmatpush.msra.mxu1 %v854_v5  ;;  %v939_v5 = vld [vmem:[#allocation6 + $0xb8] sm:$0xff] }
 0x474   :  { %v438_v23 = vpop.f32.mrf.mxu0  ;;  %2081 = vmatmul.msk.f32.gmra.mxu3 %vm287_vm2, %v694_v22  ;;  %869 = vmatpush.msra.mxu1 %v852_v7  ;;  %v838_v22 = vld [vmem:[#allocation4 + $0x50] sm:$0xff] }
 0x475   :  { %2065 = vmatmul.msk.f32.gmra.mxu1 %vm245_vm0, %v438_v23  ;;  %v839_v23 = vld [vmem:[#allocation4 + $0x58] sm:$0xff]  ;;  %v922_v7 = vld [vmem:[#allocation6 + $0x30] sm:$0xff] }
 0x476   :  { %870 = vmatpush.msra.mxu1 %v850_v10 }
 0x478   :  { %871 = vmatpush.msra.mxu1 %v848_v12 }
 0x47a   :  { %872 = vmatpush.msra.mxu1 %v846_v14  ;;  %v921_v14 = vld [vmem:[#allocation6 + $0x28] sm:$0xff] }
 0x47c   :  { %v593_v24 = vpop.f32.mrf.mxu0  ;;  %873 = vmatpush.msra.mxu1 %v844_v16 }
 0x47d   :  { %2074 = vmatmul.msk.f32.vlgmr.msrb.gmra.mxu1 %vm245_vm0, %v593_v24  ;;  %v836_v24 = vld [vmem:[#allocation4 + $0x40] sm:$0xff] }
 0x47e   :  { %874 = vmatpush.msra.mxu1 %v842_v18 }
 0x480   :  { %875 = vmatpush.msra.mxu1 %v840_v20  ;;  %v919_v20 = vld [vmem:[#allocation6 + $0x18] sm:$0xff] }
 0x482   :  { %876 = vmatpush.msra.mxu1 %v838_v22 }
 0x484   :  { %877 = vmatpush.msra.mxu1 %v836_v24 }
 0x486   :  { %878 = vmatpush.msra.mxu1 %v834_v26  ;;  %v937_v26 = vld [vmem:[#allocation6 + $0xa8] sm:$0xff] }
 0x488   :  { %879 = vmatpush.msra.mxu1 %v832_v28  ;;  %v936_v28 = vld [vmem:[#allocation6 + $0xa0] sm:$0xff] }
 0x4e5   :  { %v596_v29 = vpop.f32.mrf.mxu0 }
 0x4e6   :  { %2075 = vmatmul.msk.f32.gmra.mxu1 %vm245_vm0, %v596_v29  ;;  %v833_v29 = vld [vmem:[#allocation4 + $0x28] sm:$0xff] }
 0x4ea   :  { %v464_v32 = vpop.f32.mrf.mxu1 }
 0x4eb   :  { %v494_v35 = vadd.f32 %v2570_v60, %v464_v32  ;;  %v828_v32 = vld [vmem:[#allocation4] sm:$0xff] }
 0x4ef   :  { %v724_v30 = vpop.f32.mrf.mxu3 }
 0x4f0   :  { %2082 = vmatmul.msk.f32.vlgmr.msra.gmra.mxu0 %vm245_vm0, %v724_v30  ;;  %v830_v30 = vld [vmem:[#allocation4 + $0x10] sm:$0xff] }
 0x4f1   :  { %880 = vmatpush.msra.mxu1 %v830_v30  ;;  %v935_v30 = vld [vmem:[#allocation6 + $0x98] sm:$0xff] }
 0x4f2   :  { %v467_v33 = vpop.f32.mrf.mxu1 }
 0x4f3   :  { %v497_v40 = vadd.f32 %v2572_v2, %v467_v33  ;;  %v857_v2 = vld [vmem:[#allocation4 + $0xe8] sm:$0xff]  ;;  %881 = vmatpush.msra.mxu1 %v828_v32 }
 0x4f4   :  { %890 = vmatpush.msrb.mxu2 %v857_v2  ;;  %v829_v33 = vld [vmem:[#allocation4 + $0x8] sm:$0xff] }
 0x4f5   :  { %v925_v2 = vld [vmem:[#allocation6 + $0x48] sm:$0xff] }
 0x4f6   :  { %891 = vmatpush.msrb.mxu2 %v855_v6  ;;  %v2186_v6 = vld [vmem:[%s2969_s6] ss:$0 sm:$0xff]  ;;  %v933_v32 = vld [vmem:[#allocation6 + $0x88] sm:$0xff] }
 0x4f7   :  { %v727_v31 = vpop.f32.mrf.mxu3 }
 0x4f8   :  { %2083 = vmatmul.msk.f32.gmra.mxu0 %vm245_vm0, %v727_v31  ;;  %892 = vmatpush.msrb.mxu2 %v853_v9  ;;  %v831_v31 = vld [vmem:[#allocation4 + $0x18] sm:$0xff] }
 0x4fa   :  { %v622_v34 = vpop.f32.mrf.mxu1  ;;  %893 = vmatpush.msrb.mxu2 %v851_v11  ;;  %v938_v11 = vld [vmem:[#allocation6 + $0xb0] sm:$0xff] }
 0x4fb   :  { %v628_v36 = vadd.f32 %v622_v34, %v494_v35 }
 0x4fc   :  { %894 = vmatpush.msrb.mxu2 %v849_v13  ;;  %v2187_v13 = vld [vmem:[%s2970_s7] ss:$0 sm:$0xff] }
 0x4fe   :  { %895 = vmatpush.msrb.mxu2 %v847_v15 }
 0x500   :  { %896 = vmatpush.msrb.mxu2 %v845_v17  ;;  %v920_v17 = vld [vmem:[#allocation6 + $0x20] sm:$0xff] }
 0x502   :  { %897 = vmatpush.msrb.mxu2 %v843_v19 }
 0x504   :  { %898 = vmatpush.msrb.mxu2 %v841_v21 }
 0x506   :  { %899 = vmatpush.msrb.mxu2 %v839_v23 }
 0x508   :  { %900 = vmatpush.msrb.mxu2 %v837_v25  ;;  %v918_v25 = vld [vmem:[#allocation6 + $0x10] sm:$0xff] }
 0x50a   :  { %901 = vmatpush.msrb.mxu2 %v835_v27  ;;  %v917_v27 = vld [vmem:[#allocation6 + $0x8] sm:$0xff] }
 0x50c   :  { %902 = vmatpush.msrb.mxu2 %v833_v29  ;;  %v916_v29 = vld [vmem:[#allocation6] sm:$0xff] }
 0x50e   :  { %903 = vmatpush.msrb.mxu2 %v831_v31  ;;  %v934_v31 = vld [vmem:[#allocation6 + $0x90] sm:$0xff] }
 0x510   :  { %904 = vmatpush.msrb.mxu2 %v829_v33  ;;  %v860_v33 = vld [vmem:[%s2972_s9] sm:$0x3] }
 0x563   :  { %v625_v1 = vpop.f32.mrf.mxu1 }
 0x564   :  { %v629_v43 = vadd.f32 %v625_v1, %v497_v40  ;;  %v946_v1 = vld [vmem:[#allocation6 + $0xf0] sm:$0xff] }
 0x56d   :  { %v753_v38 = vpop.f32.mrf.mxu0 }
 0x56e   :  { %v759_v39 = vadd.f32 %v753_v38, %v628_v36  ;;  %v930_v38 = vld [vmem:[#allocation6 + $0x70] sm:$0xff] }
 0x570   :  { %v765_v0 = vadd.f32 %v2185_v37, %v759_v39  ;;  %v947_v39 = vld [vmem:[#allocation6 + $0xf8] sm:$0xff] }
 0x571   :  { %975 = vmatpush.msrb.mxu0 %v947_v39 }
 0x572   :  { %v767_v42 = vadd.f32 %v765_v0, %v2466_v41  ;;  %v778_v41 = vmul.f32 %v2231_v49, %v777_v54  ;;  %v929_v0 = vld [vmem:[#allocation6 + $0x68] sm:$0xff] }
 0x573   :  { %976 = vmatpush.msrb.mxu0 %v946_v1 }
 0x574   :  { %771 = vadd.xlane.f32.xlu0 %v767_v42  ;;  %v779_v55 = vadd.f32 %v2231_v49, %v778_v41  ;;  %v941_v41 = vld [vmem:[#allocation6 + $0xc8] sm:$0xff] }
 0x575   :  { %v756_v44 = vpop.f32.mrf.mxu0 }
 0x576   :  { %v760_v45 = vadd.f32 %v756_v44, %v629_v43  ;;  %v2661_v56 = vsel %vm780_vm4, %v2231_v49, %v779_v55  ;;  %v928_v44 = vld [vmem:[#allocation6 + $0x60] sm:$0xff] }
 0x577   :  { %v924_v55 = vld [vmem:[#allocation6 + $0x40] sm:$0xff] }
 0x578   :  { %v766_v46 = vadd.f32 %v2185_v37, %v760_v45  ;;  %v931_v37 = vld [vmem:[#allocation6 + $0x78] sm:$0xff]  ;;  %v944_v45 = vld [vmem:[#allocation6 + $0xe0] sm:$0xff] }
 0x579   :  { %952 = vmatpush.msra.mxu3 %v931_v37 }
 0x57a   :  { %v768_v60 = vadd.f32 %v766_v46, %v2473_v47 }
 0x57b   :  { %953 = vmatpush.msra.mxu3 %v930_v38  ;;  %v863_v38 = vperm.slane %v860_v33, 1 }
 0x57c   :  { %773 = vadd.xlane.f32.xlu2 %v768_v60 }
 0x57d   :  { %954 = vmatpush.msra.mxu3 %v929_v0 }
 0x57f   :  { %955 = vmatpush.msra.mxu3 %v928_v44 }
 0x581   :  { %956 = vmatpush.msra.mxu3 %v927_v48 }
 0x583   :  { %957 = vmatpush.msra.mxu3 %v926_v51 }
 0x585   :  { %958 = vmatpush.msra.mxu3 %v925_v2 }
 0x587   :  { %959 = vmatpush.msra.mxu3 %v924_v55 }
 0x5e7   :  { %v772_v47 = vpop.xlane.xlu0 %771 }
 0x5e8   :  { %v782_v57 = vmul.f32 %v2661_v56, %v772_v47 }
 0x5ea   :  { %v2664_v58 = vsub.f32 %v767_v42, %v782_v57  ;;  %v945_v42 = vld [vmem:[#allocation6 + $0xe8] sm:$0xff]  ;;  %v940_v57 = vld [vmem:[#allocation6 + $0xc0] sm:$0xff] }
 0x5eb   :  { %977 = vmatpush.msrb.mxu0 %v945_v42 }
 0x5ec   :  { %v786_v59 = vmul.f32 %v2664_v58, %v2664_v58 }
 0x5ed   :  { %978 = vmatpush.msrb.mxu0 %v944_v45 }
 0x5ee   :  { %788 = vadd.xlane.f32.xlu1 %v786_v59 }
 0x5ef   :  { %v774_v61 = vpop.xlane.xlu2 %773  ;;  %979 = vmatpush.msrb.mxu0 %v943_v50 }
 0x5f0   :  { %v783_v62 = vmul.f32 %v2661_v56, %v774_v61  ;;  %v923_v61 = vld [vmem:[#allocation6 + $0x38] sm:$0xff] }
 0x5f1   :  { %980 = vmatpush.msrb.mxu0 %v942_v53  ;;  %960 = vmatpush.msra.mxu3 %v923_v61  ;;  %v1095_v61 = vld [vmem:[#allocation2 + $0x2d0] sm:$0xff] }
 0x5f2   :  { %v2669_v63 = vsub.f32 %v768_v60, %v783_v62 }
 0x5f3   :  { %981 = vmatpush.msrb.mxu0 %v941_v41  ;;  %961 = vmatpush.msra.mxu3 %v922_v7 }
 0x5f4   :  { %v787_v3 = vmul.f32 %v2669_v63, %v2669_v63 }
 0x5f5   :  { %982 = vmatpush.msrb.mxu0 %v940_v57  ;;  %962 = vmatpush.msra.mxu3 %v921_v14  ;;  %v1099_v57 = vld [vmem:[#allocation2 + $0x2f0] sm:$0xff]  ;;  %v1092_v14 = vld [vmem:[#allocation2 + $0x2b8] sm:$0xff] }
 0x5f6   :  { %790 = vadd.xlane.f32.xlu2 %v787_v3  ;;  %1133 = vmatpush.msra.mxu2 %v1099_v57 }
 0x5f7   :  { %983 = vmatpush.msrb.mxu0 %v939_v5  ;;  %963 = vmatpush.msra.mxu3 %v920_v17  ;;  %v1089_v17 = vld [vmem:[#allocation2 + $0x2a0] sm:$0xff] }
 0x5f9   :  { %984 = vmatpush.msrb.mxu0 %v938_v11  ;;  %964 = vmatpush.msra.mxu3 %v919_v20  ;;  %v1086_v20 = vld [vmem:[#allocation2 + $0x288] sm:$0xff] }
 0x5fb   :  { %965 = vmatpush.msra.mxu3 %v918_v25  ;;  %985 = vmatpush.msrb.mxu0 %v937_v26  ;;  %v1080_v25 = vld [vmem:[#allocation2 + $0x258] sm:$0xff]  ;;  %v1081_v26 = vld [vmem:[#allocation2 + $0x260] sm:$0xff] }
 0x5fd   :  { %966 = vmatpush.msra.mxu3 %v917_v27  ;;  %986 = vmatpush.msrb.mxu0 %v936_v28  ;;  %v1082_v27 = vld [vmem:[#allocation2 + $0x268] sm:$0xff]  ;;  %v1077_v28 = vld [vmem:[#allocation2 + $0x240] sm:$0xff] }
 0x5ff   :  { %967 = vmatpush.msra.mxu3 %v916_v29  ;;  %987 = vmatpush.msrb.mxu0 %v935_v30  ;;  %v1078_v29 = vld [vmem:[#allocation2 + $0x248] sm:$0xff]  ;;  %v1079_v30 = vld [vmem:[#allocation2 + $0x250] sm:$0xff] }
 0x601   :  { %988 = vmatpush.msrb.mxu0 %v934_v31  ;;  %v1074_v31 = vld [vmem:[#allocation2 + $0x228] sm:$0xff] }
 0x603   :  { %989 = vmatpush.msrb.mxu0 %v933_v32  ;;  %v1075_v32 = vld [vmem:[#allocation2 + $0x230] sm:$0xff] }
 0x661   :  { %v789_v34 = vpop.xlane.xlu1 %788 }
 0x662   :  { %v792_v35 = vmul.f32 %v789_v34, %v2661_v56  ;;  %v862_v34 = vperm.slane %v860_v33, 0  ;;  %v1071_v33 = vld [vmem:[#allocation2 + $0x210] sm:$0xff] }
 0x664   :  { %v794_v36 = vadd.f32 1e-05, %v792_v35 }
 0x666   :  { %2232 = vrsqrt.f32 %v794_v36  ;;  %vm802_vm6 = vweird.f32 %v794_v36 }
 0x669   :  { %v791_v40 = vpop.xlane.xlu2 %790 }
 0x66a   :  { %v793_v43 = vmul.f32 %v791_v40, %v2661_v56 }
 0x66c   :  { %v2233_v46 = vpop.eup %2232  ;;  %v795_v60 = vadd.f32 1e-05, %v793_v43 }
 0x66d   :  { %v797_v49 = vmul.f32 %v2233_v46, %v794_v36  ;;  %vm803_vm5 = vweird.f32 %v2233_v46 }
 0x66e   :  { %2234 = vrsqrt.f32 %v795_v60  ;;  %vm804_vm7 = vmor %vm802_vm6, %vm803_vm5  ;;  %vm812_vm9 = vweird.f32 %v795_v60 }
 0x66f   :  { %v798_v52 = vmul.f32 %v2233_v46, %v797_v49 }
 0x671   :  { %v799_v54 = vmul.f32 0.5, %v798_v52 }
 0x673   :  { %v800_v47 = vsub.f32 1.5, %v799_v54 }
 0x674   :  { %v2235_v59 = vpop.eup %2234 }
 0x675   :  { %v801_v62 = vmul.f32 %v2233_v46, %v800_v47  ;;  %v807_v3 = vmul.f32 %v2235_v59, %v795_v60  ;;  %vm813_vm8 = vweird.f32 %v2235_v59  ;;  %v2188_v60 = vld [vmem:[%s2974_s11] ss:$0 sm:$0xff]  ;;  %v1098_v47 = vld [vmem:[#allocation2 + $0x2e8] sm:$0xff] }
 0x676   :  { %vm814_vm10 = vmor %vm812_vm9, %vm813_vm8  ;;  %1110 = vmatpush.msrb.mxu1 %v1098_v47 }
 0x677   :  { %v805_v9 = vsel %vm804_vm7, %v2233_v46, %v801_v62  ;;  %v808_v10 = vmul.f32 %v2235_v59, %v807_v3  ;;  %v1096_v62 = vld [vmem:[#allocation2 + $0x2d8] sm:$0xff]  ;;  %v1097_v3 = vld [vmem:[#allocation2 + $0x2e0] sm:$0xff] }
 0x678   :  { %v816_v12 = vmul.f32 %v805_v9, %v2664_v58  ;;  %1111 = vmatpush.msrb.mxu1 %v1095_v61  ;;  %1134 = vmatpush.msra.mxu2 %v1096_v62 }
 0x679   :  { %v809_v15 = vmul.f32 0.5, %v808_v10 }
 0x67a   :  { %v821_v16 = vmul.f32 %v2186_v6, %v816_v12  ;;  %1112 = vmatpush.msrb.mxu1 %v1092_v14 }
 0x67b   :  { %v810_v18 = vsub.f32 1.5, %v809_v15  ;;  %v1093_v15 = vld [vmem:[#allocation2 + $0x2c0] sm:$0xff] }
 0x67c   :  { %v826_v19 = vadd.f32 %v2187_v13, %v821_v16  ;;  %v1094_v16 = vld [vmem:[#allocation2 + $0x2c8] sm:$0xff]  ;;  %1135 = vmatpush.msra.mxu2 %v1093_v15  ;;  %1113 = vmatpush.msrb.mxu1 %v1089_v17  ;;  %v2190_v15 = vld [vmem:[%s2976_s13] ss:$0 sm:$0xff] }
 0x67d   :  { %v811_v21 = vmul.f32 %v2235_v59, %v810_v18  ;;  %v1090_v18 = vld [vmem:[#allocation2 + $0x2a8] sm:$0xff] }
 0x67e   :  { %882 = vmatmul.f32.vlgmr.msra.gmra.mxu1 %v826_v19  ;;  %905 = vmatmul.f32.vlgmr.msrb.gmra.mxu2 %v826_v19 }
 0x67f   :  { %v815_v58 = vsel %vm814_vm10, %v2235_v59, %v811_v21  ;;  %v1100_v59 = vld [vmem:[#allocation2 + $0x2f8] sm:$0xff]  ;;  %1136 = vmatpush.msra.mxu2 %v1090_v18  ;;  %v1087_v21 = vld [vmem:[#allocation2 + $0x290] sm:$0xff]  ;;  %1114 = vmatpush.msrb.mxu1 %v1086_v20 }
 0x680   :  { %v817_v22 = vmul.f32 %v815_v58, %v2669_v63  ;;  %v932_v63 = vld [vmem:[#allocation6 + $0x80] sm:$0xff]  ;;  %1156 = vmatpush.msrb.mxu3 %v1100_v59  ;;  %v1088_v58 = vld [vmem:[#allocation2 + $0x298] sm:$0xff] }
 0x681   :  { %990 = vmatpush.msrb.mxu0 %v932_v63  ;;  %1137 = vmatpush.msra.mxu2 %v1087_v21  ;;  %v1076_v63 = vld [vmem:[#allocation2 + $0x238] sm:$0xff] }
 0x682   :  { %v822_v23 = vmul.f32 %v2186_v6, %v817_v22  ;;  %1157 = vmatpush.msrb.mxu3 %v1097_v3  ;;  %v1083_v22 = vld [vmem:[#allocation2 + $0x270] sm:$0xff] }
 0x683   :  { %1115 = vmatpush.msrb.mxu1 %v1083_v22 }
 0x684   :  { %v827_v24 = vadd.f32 %v2187_v13, %v822_v23  ;;  %1158 = vmatpush.msrb.mxu3 %v1094_v16  ;;  %v1084_v23 = vld [vmem:[#allocation2 + $0x278] sm:$0xff] }
 0x685   :  { %1138 = vmatpush.msra.mxu2 %v1084_v23  ;;  %1116 = vmatpush.msrb.mxu1 %v1080_v25  ;;  %v2084_v25 = vld [vmem:[%s2966_s3 + $0x3] sm:$0x7] }
 0x686   :  { %885 = vmatmul.f32.gmra.mxu1 %v827_v24  ;;  %908 = vmatmul.f32.gmra.mxu2 %v827_v24 }
 0x687   :  { %1139 = vmatpush.msra.mxu2 %v1081_v26  ;;  %1117 = vmatpush.msrb.mxu1 %v1077_v28  ;;  %v1106_v26 = vperm.slane %v2084_v25, 2 }
 0x689   :  { %1140 = vmatpush.msra.mxu2 %v1078_v29  ;;  %1118 = vmatpush.msrb.mxu1 %v1074_v31 }
 0x68b   :  { %1141 = vmatpush.msra.mxu2 %v1075_v32  ;;  %1119 = vmatpush.msrb.mxu1 %v1071_v33 }
 0x6fb   :  { %v883_v35 = vpop.f32.mrf.mxu1 }
 0x6fc   :  { %v884_v36 = vadd.f32 %v883_v35, %v862_v34  ;;  %v1073_v35 = vld [vmem:[#allocation2 + $0x220] sm:$0xff] }
 0x6fe   :  { %v912_v37 = vmax.f32 %v884_v36, 0.0  ;;  %v1068_v36 = vld [vmem:[#allocation2 + $0x1f8] sm:$0xff] }
 0x6ff   :  { %1120 = vmatpush.msrb.mxu1 %v1068_v36 }
 0x700   :  { %968 = vmatmul.f32.vlgmr.msra.gmra.mxu3 %v912_v37  ;;  %v1069_v37 = vld [vmem:[#allocation2 + $0x200] sm:$0xff] }
 0x701   :  { %v906_v39 = vpop.f32.mrf.mxu2 }
 0x702   :  { %v907_v0 = vadd.f32 %v906_v39, %v863_v38  ;;  %v1065_v39 = vld [vmem:[#allocation2 + $0x1e0] sm:$0xff] }
 0x703   :  { %v886_v1 = vpop.f32.mrf.mxu1  ;;  %1121 = vmatpush.msrb.mxu1 %v1065_v39 }
 0x704   :  { %v913_v40 = vmax.f32 %v907_v0, 0.0  ;;  %v887_v42 = vadd.f32 %v886_v1, %v862_v34  ;;  %v1072_v34 = vld [vmem:[#allocation2 + $0x218] sm:$0xff]  ;;  %v1066_v0 = vld [vmem:[#allocation2 + $0x1e8] sm:$0xff]  ;;  %v1067_v1 = vld [vmem:[#allocation2 + $0x1f0] sm:$0xff] }
 0x705   :  { %1142 = vmatpush.msra.mxu2 %v1072_v34 }
 0x706   :  { %v914_v43 = vmax.f32 %v887_v42, 0.0  ;;  %991 = vmatmul.f32.vlgmr.msrb.gmra.mxu0 %v913_v40  ;;  %v1062_v40 = vld [vmem:[#allocation2 + $0x1c8] sm:$0xff]  ;;  %v1063_v42 = vld [vmem:[#allocation2 + $0x1d0] sm:$0xff] }
 0x707   :  { %1143 = vmatpush.msra.mxu2 %v1069_v37  ;;  %1122 = vmatpush.msrb.mxu1 %v1062_v40 }
 0x708   :  { %971 = vmatmul.f32.gmra.mxu3 %v914_v43  ;;  %v1064_v43 = vld [vmem:[#allocation2 + $0x1d8] sm:$0xff] }
 0x709   :  { %v909_v44 = vpop.f32.mrf.mxu2  ;;  %1144 = vmatpush.msra.mxu2 %v1066_v0 }
 0x70a   :  { %v910_v45 = vadd.f32 %v909_v44, %v863_v38  ;;  %v1070_v38 = vld [vmem:[#allocation2 + $0x208] sm:$0xff]  ;;  %v1059_v44 = vld [vmem:[#allocation2 + $0x1b0] sm:$0xff] }
 0x70b   :  { %1145 = vmatpush.msra.mxu2 %v1063_v42  ;;  %1123 = vmatpush.msrb.mxu1 %v1059_v44 }
 0x70c   :  { %v915_v46 = vmax.f32 %v910_v45, 0.0  ;;  %v1060_v45 = vld [vmem:[#allocation2 + $0x1b8] sm:$0xff] }
 0x70d   :  { %1146 = vmatpush.msra.mxu2 %v1060_v45 }
 0x70e   :  { %994 = vmatmul.f32.gmra.mxu0 %v915_v46  ;;  %v1061_v46 = vld [vmem:[#allocation2 + $0x1c0] sm:$0xff] }
 0x783   :  { %v969_v48 = vpop.f32.mrf.mxu3  ;;  %v992_v49 = vpop.f32.mrf.mxu0 }
 0x784   :  { %v970_v50 = vadd.f32 %v2188_v60, %v969_v48  ;;  %v1057_v48 = vld [vmem:[#allocation2 + $0x1a0] sm:$0xff] }
 0x785   :  { %1147 = vmatpush.msra.mxu2 %v1057_v48 }
 0x786   :  { %v993_v51 = vadd.f32 %v992_v49, %v970_v50  ;;  %v1058_v49 = vld [vmem:[#allocation2 + $0x1a8] sm:$0xff]  ;;  %v1053_v50 = vld [vmem:[#allocation2 + $0x180] sm:$0xff] }
 0x788   :  { %v998_v52 = vadd.f32 %v993_v51, %v826_v19  ;;  %v1091_v19 = vld [vmem:[#allocation2 + $0x2b0] sm:$0xff]  ;;  %v1054_v51 = vld [vmem:[#allocation2 + $0x188] sm:$0xff] }
 0x789   :  { %1159 = vmatpush.msrb.mxu3 %v1091_v19  ;;  %1148 = vmatpush.msra.mxu2 %v1054_v51 }
 0x78a   :  { %1002 = vadd.xlane.f32.xlu2 %v998_v52 }
 0x78b   :  { %v972_v53 = vpop.f32.mrf.mxu3  ;;  %v995_v54 = vpop.f32.mrf.mxu0  ;;  %1160 = vmatpush.msrb.mxu3 %v1088_v58 }
 0x78c   :  { %v973_v2 = vadd.f32 %v2188_v60, %v972_v53  ;;  %v1056_v60 = vld [vmem:[#allocation2 + $0x198] sm:$0xff] }
 0x78d   :  { %1124 = vmatpush.msrb.mxu1 %v1056_v60 }
 0x78e   :  { %v996_v41 = vadd.f32 %v995_v54, %v973_v2 }
 0x78f   :  { %1125 = vmatpush.msrb.mxu1 %v1053_v50 }
 0x790   :  { %v999_v55 = vadd.f32 %v996_v41, %v827_v24  ;;  %v1085_v24 = vld [vmem:[#allocation2 + $0x280] sm:$0xff] }
 0x791   :  { %1161 = vmatpush.msrb.mxu3 %v1085_v24 }
 0x792   :  { %1004 = vadd.xlane.f32.xlu2 %v999_v55 }
 0x793   :  { %1162 = vmatpush.msrb.mxu3 %v1082_v27  ;;  %v1105_v27 = vperm.slane %v2084_v25, 1 }
 0x795   :  { %1163 = vmatpush.msrb.mxu3 %v1079_v30 }
 0x797   :  { %1164 = vmatpush.msrb.mxu3 %v1076_v63  ;;  %v1104_v63 = vperm.slane %v2084_v25, 0 }
 0x799   :  { %1165 = vmatpush.msrb.mxu3 %v1073_v35 }
 0x79b   :  { %1166 = vmatpush.msrb.mxu3 %v1070_v38 }
 0x79d   :  { %1167 = vmatpush.msrb.mxu3 %v1067_v1 }
 0x79f   :  { %1168 = vmatpush.msrb.mxu3 %v1064_v43 }
 0x7a1   :  { %1169 = vmatpush.msrb.mxu3 %v1061_v46 }
 0x7a3   :  { %1170 = vmatpush.msrb.mxu3 %v1058_v49 }
 0x7fd   :  { %v1003_v5 = vpop.xlane.xlu2 %1002 }
 0x7fe   :  { %v1006_v6 = vmul.f32 %v1003_v5, %v2661_v56 }
 0x800   :  { %v2690_v7 = vsub.f32 %v998_v52, %v1006_v6  ;;  %v1055_v52 = vld [vmem:[#allocation2 + $0x190] sm:$0xff] }
 0x801   :  { %1171 = vmatpush.msrb.mxu3 %v1055_v52 }
 0x802   :  { %v1010_v9 = vmul.f32 %v2690_v7, %v2690_v7 }
 0x804   :  { %1012 = vadd.xlane.f32.xlu2 %v1010_v9 }
 0x805   :  { %v1005_v10 = vpop.xlane.xlu2 %1004 }
 0x806   :  { %v1007_v11 = vmul.f32 %v1005_v10, %v2661_v56  ;;  %v2189_v10 = vld [vmem:[%s2975_s12] ss:$0 sm:$0xff] }
 0x808   :  { %v2695_v12 = vsub.f32 %v999_v55, %v1007_v11 }
 0x80a   :  { %v1011_v13 = vmul.f32 %v2695_v12, %v2695_v12 }
 0x80c   :  { %1014 = vadd.xlane.f32.xlu0 %v1011_v13 }
 0x877   :  { %v1013_v53 = vpop.xlane.xlu2 %1012 }
 0x878   :  { %v1016_v2 = vmul.f32 %v1013_v53, %v2661_v56 }
 0x87a   :  { %v1018_v54 = vadd.f32 1e-05, %v1016_v2 }
 0x87c   :  { %2236 = vrsqrt.f32 %v1018_v54  ;;  %vm1026_vm12 = vweird.f32 %v1018_v54 }
 0x87f   :  { %v1015_v41 = vpop.xlane.xlu0 %1014 }
 0x880   :  { %v1017_v55 = vmul.f32 %v1015_v41, %v2661_v56 }
 0x882   :  { %v2237_v47 = vpop.eup %2236  ;;  %v1019_v57 = vadd.f32 1e-05, %v1017_v55  ;;  %v2088_v55 = vld [vmem:[%s2967_s4 + $0x98] sm:$0xff] }
 0x883   :  { %v1021_v59 = vmul.f32 %v2237_v47, %v1018_v54  ;;  %vm1027_vm11 = vweird.f32 %v2237_v47 }
 0x884   :  { %2238 = vrsqrt.f32 %v1019_v57  ;;  %vm1028_vm13 = vmor %vm1026_vm12, %vm1027_vm11  ;;  %vm1036_vm15 = vweird.f32 %v1019_v57 }
 0x885   :  { %v1022_v61 = vmul.f32 %v2237_v47, %v1021_v59  ;;  %v2085_v59 = vld [vmem:[%s2967_s4 + $0x80] sm:$0xff] }
 0x887   :  { %v1023_v62 = vmul.f32 0.5, %v1022_v61 }
 0x889   :  { %v1024_v3 = vsub.f32 1.5, %v1023_v62 }
 0x88a   :  { %v2239_v5 = vpop.eup %2238 }
 0x88b   :  { %v1025_v6 = vmul.f32 %v2237_v47, %v1024_v3  ;;  %v1031_v9 = vmul.f32 %v2239_v5, %v1019_v57  ;;  %vm1037_vm14 = vweird.f32 %v2239_v5  ;;  %v2086_v57 = vld [vmem:[%s2967_s4 + $0x88] sm:$0xff] }
 0x88c   :  { %vm1038_vm4 = vmor %vm1036_vm15, %vm1037_vm14 }
 0x88d   :  { %v1029_v11 = vsel %vm1028_vm13, %v2237_v47, %v1025_v6  ;;  %v1032_v13 = vmul.f32 %v2239_v5, %v1031_v9  ;;  %v2087_v47 = vld [vmem:[%s2967_s4 + $0x90] sm:$0xff] }
 0x88e   :  { %v1040_v14 = vmul.f32 %v1029_v11, %v2690_v7 }
 0x88f   :  { %v1033_v16 = vmul.f32 0.5, %v1032_v13 }
 0x890   :  { %v1045_v17 = vmul.f32 %v2189_v10, %v1040_v14 }
 0x891   :  { %v1034_v18 = vsub.f32 1.5, %v1033_v16 }
 0x892   :  { %v2708_v19 = vadd.f32 %v2190_v15, %v1045_v17 }
 0x893   :  { %v1035_v20 = vmul.f32 %v2239_v5, %v1034_v18 }
 0x894   :  { %1126 = vmatmul.f32.vlgmr.msrb.gmra.mxu1 %v2708_v19  ;;  %1149 = vmatmul.f32.vlgmr.msra.gmra.mxu2 %v2708_v19 }
 0x895   :  { %v1039_v21 = vsel %vm1038_vm4, %v2239_v5, %v1035_v20  ;;  %1172 = vmatmul.f32.vlgmr.msrb.gmra.mxu3 %v2708_v19 }
 0x896   :  { %v1041_v7 = vmul.f32 %v1039_v21, %v2695_v12 }
 0x898   :  { %v1046_v58 = vmul.f32 %v2189_v10, %v1041_v7 }
 0x89a   :  { %v2714_v22 = vadd.f32 %v2190_v15, %v1046_v58 }
 0x89c   :  { %1129 = vmatmul.f32.gmra.mxu1 %v2714_v22  ;;  %1152 = vmatmul.f32.gmra.mxu2 %v2714_v22 }
 0x89d   :  { %1175 = vmatmul.f32.gmra.mxu3 %v2714_v22 }
 0x911   :  { %v1127_v32 = vpop.f32.mrf.mxu1 }
 0x912   :  { %v1128_v35 = vadd.f32 %v1127_v32, %v1104_v63 }
 0x917   :  { %v1150_v23 = vpop.f32.mrf.mxu2 }
 0x918   :  { %v1173_v24 = vpop.f32.mrf.mxu3  ;;  %v1151_v34 = vadd.f32 %v1150_v23, %v1105_v27 }
 0x919   :  { %v1174_v30 = vadd.f32 %v1173_v24, %v1106_v26  ;;  %v1130_v36 = vpop.f32.mrf.mxu1 }
 0x91a   :  { %v1131_v37 = vadd.f32 %v1130_v36, %v1104_v63 }
 0x91f   :  { %v1153_v28 = vpop.f32.mrf.mxu2 }
 0x920   :  { %v1154_v29 = vadd.f32 %v1153_v28, %v1105_v27  ;;  %v1176_v12 = vpop.f32.mrf.mxu3 }
 0x921   :  { %v1177_v31 = vadd.f32 %v1176_v12, %v1106_v26 }
 0x922   :  { %2101 = vmatpush.xpose.msk.msra.mxu0 %vm245_vm0, %v1154_v29 }
 0x923   :  { %v2723_v33 = vpack.i.bf16 %v1174_v30, %v1177_v31 }
 0x926   :  { %2102 = vmatpush.xpose.msk.msra.mxu0 %vm245_vm0, %v1151_v34 }
 0x929   :  { %2103 = vmatmul.msk.f32.vlgmr.msra.gmra.mxu0 %vm245_vm0, %v1128_v35 }
 0x92a   :  { %1277 = vmatpush.msrb.mxu0 %v1177_v31 }
 0x92c   :  { %1278 = vmatpush.msrb.mxu0 %v1174_v30 }
 0x92e   :  { %1435 = vmatpush.msra.mxu0 %v2088_v55 }
 0x930   :  { %1436 = vmatpush.msra.mxu0 %v2087_v47 }
 0x931   :  { %2104 = vmatmul.msk.f32.gmra.mxu0 %vm245_vm0, %v1131_v37 }
 0x932   :  { %1437 = vmatpush.msra.mxu0 %v2086_v57 }
 0x934   :  { %1438 = vmatpush.msra.mxu0 %v2085_v59 }
 0x9a6   :  { %v1225_v38 = vpop.f32.mrf.mxu0 }
 0x9a7   :  { %v1231_v39 = vmul.f32 0.17677669, %v1225_v38 }
 0x9a9   :  { %v1233_v0 = vsel %vm283_vm1, %v1231_v39, -1e+09 }
 0x9aa   :  { %v1235_v1 = vsel %vm287_vm2, %v1233_v0, -inf }
 0x9ab   :  { %1236 = vmax.xlane.f32.xlu2 %v1235_v1 }
 0x9ae   :  { %v1228_v40 = vpop.f32.mrf.mxu0 }
 0x9af   :  { %v1232_v42 = vmul.f32 0.17677669, %v1228_v40 }
 0x9b1   :  { %v1234_v43 = vsel %vm284_vm3, %v1232_v42, -1e+09 }
 0x9b2   :  { %v1238_v44 = vsel %vm287_vm2, %v1234_v43, -inf }
 0x9b3   :  { %1239 = vmax.xlane.f32.xlu0 %v1238_v44 }
 0x9c7   :  { %1292 = vrot.lane.b32.xlu0 %v1154_v29, %s2365_s0 }
 0x9cf   :  { %1288 = vrot.lane.b32.xlu0 %v1131_v37, %s2365_s0 }
 0x9d7   :  { %1450 = vrot.lane.b32.xlu0 %v1151_v34, %s2366_s17 }
 0x9df   :  { %1581 = vrot.lane.b32.xlu0 %v1151_v34, %s2367_s18 }
 0x9e7   :  { %1579 = vrot.lane.b32.xlu0 %v1131_v37, %s2367_s18 }
 0xa1e   :  { %v1237_v45 = vpop.xlane.xlu2 %1236 }
 0xa1f   :  { %v1241_v46 = vsub.f32 %v1233_v0, %v1237_v45 }
 0xa21   :  { %v1243_v60 = vmul.f32 1.442695, %v1241_v46 }
 0xa23   :  { %2240 = vpow2.f32 %v1243_v60 }
 0xa26   :  { %v1240_v48 = vpop.xlane.xlu0 %1239 }
 0xa27   :  { %v1242_v49 = vsub.f32 %v1234_v43, %v1240_v48 }
 0xa29   :  { %v2241_v50 = vpop.eup %2240  ;;  %v1245_v51 = vmul.f32 1.442695, %v1242_v49 }
 0xa2a   :  { %v1247_v52 = vsel %vm287_vm2, %v2241_v50, 0.0 }
 0xa2b   :  { %2242 = vpow2.f32 %v1245_v51  ;;  %1248 = vadd.xlane.f32.xlu1 %v1247_v52 }
 0xa31   :  { %v2243_v53 = vpop.eup %2242 }
 0xa32   :  { %v1250_v2 = vsel %vm287_vm2, %v2243_v53, 0.0 }
 0xa33   :  { %1251 = vadd.xlane.f32.xlu2 %v1250_v2 }
 0xa39   :  { %v1293_v54 = vpop.permute.xlu0 %1292 }
 0xa3a   :  { %2107 = vmatpush.xpose.msk.msra.mxu1 %vm245_vm0, %v1293_v54 }
 0xa41   :  { %v1289_v9 = vpop.permute.xlu0 %1288 }
 0xa44   :  { %1290 = vrot.lane.b32.xlu1 %v1151_v34, %s2365_s0 }
 0xa49   :  { %v1451_v14 = vpop.permute.xlu0 %1450 }
 0xa4b   :  { %1286 = vrot.lane.b32.xlu2 %v1128_v35, %s2365_s0 }
 0xa4c   :  { %1452 = vrot.lane.b32.xlu1 %v1154_v29, %s2366_s17 }
 0xa51   :  { %v1582_v17 = vpop.permute.xlu0 %1581 }
 0xa53   :  { %1446 = vrot.lane.b32.xlu2 %v1128_v35, %s2366_s17 }
 0xa54   :  { %1583 = vrot.lane.b32.xlu1 %v1154_v29, %s2367_s18 }
 0xa59   :  { %v1580_v26 = vpop.permute.xlu0 %1579 }
 0xa5b   :  { %1448 = vrot.lane.b32.xlu2 %v1131_v37, %s2366_s17 }
 0xa5c   :  { %1577 = vrot.lane.b32.xlu1 %v1128_v35, %s2367_s18 }
 0xa9e   :  { %v1249_v41 = vpop.xlane.xlu1 %1248 }
 0xa9f   :  { %2244 = vrcp.f32 %v1249_v41 }
 0xaa5   :  { %v2245_v61 = vpop.eup %2244 }
 0xaa6   :  { %v1255_v62 = vmul.f32 %v2245_v61, %v2241_v50  ;;  %v1252_v3 = vpop.xlane.xlu2 %1251 }
 0xaa7   :  { %2246 = vrcp.f32 %v1252_v3 }
 0xaa8   :  { %2105 = vmatmul.msk.f32.vlgmr.msrb.gmra.mxu0 %vm287_vm2, %v1255_v62 }
 0xaad   :  { %v2247_v5 = vpop.eup %2246 }
 0xaae   :  { %v1256_v6 = vmul.f32 %v2247_v5, %v2243_v53  ;;  %v1287_v11 = vpop.permute.xlu2 %1286 }
 0xab0   :  { %2106 = vmatmul.msk.f32.gmra.mxu0 %vm287_vm2, %v1256_v6 }
 0xab6   :  { %v1291_v10 = vpop.permute.xlu1 %1290  ;;  %v1447_v16 = vpop.permute.xlu2 %1446 }
 0xab7   :  { %2108 = vmatpush.xpose.msk.msra.mxu1 %vm245_vm0, %v1291_v10 }
 0xaba   :  { %2109 = vmatmul.msk.f32.vlgmr.msra.gmra.mxu1 %vm245_vm0, %v1287_v11 }
 0xabe   :  { %v1453_v13 = vpop.permute.xlu1 %1452  ;;  %v1449_v18 = vpop.permute.xlu2 %1448 }
 0xabf   :  { %2117 = vmatpush.xpose.msk.msrb.mxu1 %vm245_vm0, %v1453_v13 }
 0xac2   :  { %2110 = vmatmul.msk.f32.gmra.mxu1 %vm245_vm0, %v1289_v9 }
 0xac3   :  { %2118 = vmatpush.xpose.msk.msrb.mxu1 %vm245_vm0, %v1451_v14 }
 0xac6   :  { %v1584_v15 = vpop.permute.xlu1 %1583 }
 0xac7   :  { %2125 = vmatpush.xpose.msk.msrb.mxu0 %vm245_vm0, %v1584_v15 }
 0xaca   :  { %2119 = vmatmul.msk.f32.vlgmr.msrb.gmra.mxu1 %vm245_vm0, %v1447_v16 }
 0xacb   :  { %2126 = vmatpush.xpose.msk.msrb.mxu0 %vm245_vm0, %v1582_v17 }
 0xace   :  { %v1578_v7 = vpop.permute.xlu1 %1577 }
 0xad2   :  { %2120 = vmatmul.msk.f32.gmra.mxu1 %vm245_vm0, %v1449_v18 }
 0xb25   :  { %v1280_v20 = vpop.f32.mrf.mxu0 }
 0xb26   :  { %2115 = vmatmul.msk.f32.vlgmr.msra.gmra.mxu0 %vm245_vm0, %v1280_v20 }
 0xb2d   :  { %v1283_v21 = vpop.f32.mrf.mxu0 }
 0xb2e   :  { %2116 = vmatmul.msk.f32.gmra.mxu0 %vm245_vm0, %v1283_v21 }
 0xb36   :  { %2127 = vmatmul.msk.f32.vlgmr.msrb.gmra.mxu0 %vm245_vm0, %v1578_v7 }
 0xb37   :  { %v1319_v58 = vpop.f32.mrf.mxu1 }
 0xb38   :  { %v1325_v23 = vmul.f32 0.17677669, %v1319_v58 }
 0xb3a   :  { %v1327_v24 = vsel %vm283_vm1, %v1325_v23, -1e+09 }
 0xb3b   :  { %v1329_v25 = vsel %vm287_vm2, %v1327_v24, -inf }
 0xb3c   :  { %1330 = vmax.xlane.f32.xlu2 %v1329_v25 }
 0xb3e   :  { %2128 = vmatmul.msk.f32.gmra.mxu0 %vm245_vm0, %v1580_v26 }
 0xb3f   :  { %v1322_v27 = vpop.f32.mrf.mxu1 }
 0xb40   :  { %v1326_v28 = vmul.f32 0.17677669, %v1322_v27 }
 0xb42   :  { %v1328_v29 = vsel %vm284_vm3, %v1326_v28, -1e+09 }
 0xb43   :  { %v1332_v12 = vsel %vm287_vm2, %v1328_v29, -inf }
 0xb44   :  { %1333 = vmax.xlane.f32.xlu1 %v1332_v12 }
 0xb47   :  { %v1479_v30 = vpop.f32.mrf.mxu1 }
 0xb48   :  { %v1485_v31 = vmul.f32 0.17677669, %v1479_v30 }
 0xb4a   :  { %v1487_v32 = vsel %vm283_vm1, %v1485_v31, -1e+09 }
 0xb4b   :  { %v1489_v63 = vsel %vm287_vm2, %v1487_v32, -inf }
 0xb4c   :  { %1490 = vmax.xlane.f32.xlu0 %v1489_v63 }
 0xb4f   :  { %v1482_v34 = vpop.f32.mrf.mxu1 }
 0xb50   :  { %v1486_v35 = vmul.f32 0.17677669, %v1482_v34 }
 0xb52   :  { %v1488_v36 = vsel %vm284_vm3, %v1486_v35, -1e+09 }
 0xb53   :  { %v1492_v37 = vsel %vm287_vm2, %v1488_v36, -inf }
 0xb54   :  { %1493 = vmax.xlane.f32.xlu2 %v1492_v37 }
 0xba3   :  { %v2788_v38 = vpop.f32.mrf.mxu0 }
 0xbab   :  { %v2790_v39 = vpop.f32.mrf.mxu0 }
 0xbaf   :  { %v1331_v0 = vpop.xlane.xlu2 %1330 }
 0xbb0   :  { %v1335_v1 = vsub.f32 %v1327_v24, %v1331_v0  ;;  %v2092_v0 = vld [vmem:[%s2967_s4 + $0xb8] sm:$0xff] }
 0xbb1   :  { %1406 = vmatpush.msra.mxu3 %v2092_v0  ;;  %v1788_v0 = vld [vmem:[#allocation4 + $0x180] sm:$0xff] }
 0xbb2   :  { %v1337_v40 = vmul.f32 1.442695, %v1335_v1  ;;  %v2091_v1 = vld [vmem:[%s2967_s4 + $0xb0] sm:$0xff] }
 0xbb3   :  { %v1610_v42 = vpop.f32.mrf.mxu0  ;;  %1407 = vmatpush.msra.mxu3 %v2091_v1  ;;  %v1789_v1 = vld [vmem:[#allocation4 + $0x188] sm:$0xff] }
 0xbb4   :  { %2248 = vpow2.f32 %v1337_v40  ;;  %v1616_v43 = vmul.f32 0.17677669, %v1610_v42  ;;  %v2090_v40 = vld [vmem:[%s2967_s4 + $0xa8] sm:$0xff] }
 0xbb5   :  { %1408 = vmatpush.msra.mxu3 %v2090_v40  ;;  %v1786_v40 = vld [vmem:[#allocation4 + $0x170] sm:$0xff] }
 0xbb6   :  { %v1618_v44 = vsel %vm283_vm1, %v1616_v43, -1e+09  ;;  %v2089_v43 = vld [vmem:[%s2967_s4 + $0xa0] sm:$0xff] }
 0xbb7   :  { %v1334_v45 = vpop.xlane.xlu1 %1333  ;;  %v1620_v46 = vsel %vm287_vm2, %v1618_v44, -inf  ;;  %1409 = vmatpush.msra.mxu3 %v2089_v43  ;;  %v1784_v43 = vld [vmem:[#allocation4 + $0x160] sm:$0xff] }
 0xbb8   :  { %v1336_v60 = vsub.f32 %v1328_v29, %v1334_v45  ;;  %1621 = vmax.xlane.f32.xlu1 %v1620_v46 }
 0xbba   :  { %v2249_v48 = vpop.eup %2248  ;;  %v1339_v49 = vmul.f32 1.442695, %v1336_v60  ;;  %v2096_v60 = vld [vmem:[%s2967_s4 + $0xd8] sm:$0xff] }
 0xbbb   :  { %v1613_v50 = vpop.f32.mrf.mxu0  ;;  %v1341_v51 = vsel %vm287_vm2, %v2249_v48, 0.0  ;;  %1564 = vmatpush.msrb.mxu3 %v2096_v60  ;;  %v1780_v60 = vld [vmem:[#allocation4 + $0x140] sm:$0xff] }
 0xbbc   :  { %v1617_v52 = vmul.f32 0.17677669, %v1613_v50  ;;  %1342 = vadd.xlane.f32.xlu2 %v1341_v51  ;;  %2250 = vpow2.f32 %v1339_v49  ;;  %v2094_v49 = vld [vmem:[%s2967_s4 + $0xc8] sm:$0xff] }
 0xbbe   :  { %v1619_v53 = vsel %vm284_vm3, %v1617_v52, -1e+09  ;;  %v2093_v52 = vld [vmem:[%s2967_s4 + $0xc0] sm:$0xff] }
 0xbbf   :  { %v1491_v2 = vpop.xlane.xlu0 %1490  ;;  %v1623_v4 = vsel %vm287_vm2, %v1619_v53, -inf }
 0xbc0   :  { %v1495_v54 = vsub.f32 %v1487_v32, %v1491_v2  ;;  %1624 = vmax.xlane.f32.xlu0 %v1623_v4  ;;  %v2099_v2 = vld [vmem:[%s2967_s4 + $0xf0] sm:$0xff]  ;;  %v2098_v4 = vld [vmem:[%s2967_s4 + $0xe8] sm:$0xff] }
 0xbc2   :  { %v1497_v41 = vmul.f32 1.442695, %v1495_v54  ;;  %v2251_v55 = vpop.eup %2250 }
 0xbc3   :  { %v1344_v57 = vsel %vm287_vm2, %v2251_v55, 0.0 }
 0xbc4   :  { %2252 = vpow2.f32 %v1497_v41 }
 0xbc7   :  { %v1494_v47 = vpop.xlane.xlu2 %1493 }
 0xbc8   :  { %v1496_v59 = vsub.f32 %v1488_v36, %v1494_v47  ;;  %1345 = vadd.xlane.f32.xlu0 %v1344_v57  ;;  %v2097_v57 = vld [vmem:[%s2967_s4 + $0xe0] sm:$0xff] }
 0xbca   :  { %v2253_v61 = vpop.eup %2252  ;;  %v1499_v62 = vmul.f32 1.442695, %v1496_v59 }
 0xbcb   :  { %v1501_v3 = vsel %vm287_vm2, %v2253_v61, 0.0 }
 0xbcc   :  { %2254 = vpow2.f32 %v1499_v62  ;;  %1502 = vadd.xlane.f32.xlu2 %v1501_v3 }
 0xbd1   :  { %2171 = vrot.lane.b32.xlu1 %v2723_v33, %s2365_s0 }
 0xbd2   :  { %v2255_v8 = vpop.eup %2254 }
 0xbd3   :  { %v1504_v5 = vsel %vm287_vm2, %v2255_v8, 0.0 }
 0xbd4   :  { %1505 = vadd.xlane.f32.xlu2 %v1504_v5 }
 0xbd9   :  { %2181 = vrot.lane.b32.xlu1 %v2723_v33, %s2367_s18 }
 0xbdc   :  { %2176 = vrot.lane.b32.xlu0 %v2723_v33, %s2366_s17 }
 0xc2b   :  { %v1622_v6 = vpop.xlane.xlu1 %1621 }
 0xc2c   :  { %v1626_v9 = vsub.f32 %v1618_v44, %v1622_v6 }
 0xc2e   :  { %v1628_v10 = vmul.f32 1.442695, %v1626_v9  ;;  %v2191_v9 = vld [vmem:[%s2968_s5 + $0x1] ss:$0 sm:$0xff] }
 0xc2f   :  { %v1343_v17 = vpop.xlane.xlu2 %1342 }
 0xc30   :  { %2256 = vpow2.f32 %v1628_v10 }
 0xc33   :  { %v1625_v11 = vpop.xlane.xlu0 %1624 }
 0xc34   :  { %v1627_v13 = vsub.f32 %v1619_v53, %v1625_v11  ;;  %v2100_v53 = vld [vmem:[%s2967_s4 + $0xf8] sm:$0xff] }
 0xc36   :  { %v2257_v14 = vpop.eup %2256  ;;  %v1630_v15 = vmul.f32 1.442695, %v1627_v13 }
 0xc37   :  { %v1632_v16 = vsel %vm287_vm2, %v2257_v14, 0.0 }
 0xc38   :  { %2258 = vpow2.f32 %v1630_v15  ;;  %1633 = vadd.xlane.f32.xlu2 %v1632_v16 }
 0xc39   :  { %2260 = vrcp.f32 %v1343_v17 }
 0xc3b   :  { %v1346_v21 = vpop.xlane.xlu0 %1345 }
 0xc3c   :  { %2262 = vrcp.f32 %v1346_v21 }
 0xc3e   :  { %v2259_v18 = vpop.eup %2258 }
 0xc3f   :  { %v1635_v20 = vsel %vm287_vm2, %v2259_v18, 0.0  ;;  %v2261_v7 = vpop.eup %2260  ;;  %v1503_v25 = vpop.xlane.xlu2 %1502 }
 0xc40   :  { %1636 = vadd.xlane.f32.xlu2 %v1635_v20  ;;  %v1349_v24 = vmul.f32 %v2261_v7, %v2249_v48  ;;  %2264 = vrcp.f32 %v1503_v25  ;;  %v2095_v48 = vld [vmem:[%s2967_s4 + $0xd0] sm:$0xff]  ;;  %v1803_v7 = vld [vmem:[#allocation4 + $0x1f8] sm:$0xff] }
 0xc41   :  { %1565 = vmatpush.msrb.mxu3 %v2095_v48  ;;  %1834 = vmatpush.msra.mxu0 %v1803_v7  ;;  %v1781_v48 = vld [vmem:[#allocation4 + $0x148] sm:$0xff]  ;;  %v1886_v7 = vld [vmem:[#allocation6 + $0x1c0] sm:$0xff] }
 0xc42   :  { %v2263_v27 = vpop.eup %2262 }
 0xc43   :  { %v2172_v33 = vpop.permute.xlu1 %2171  ;;  %v1350_v31 = vmul.f32 %v2263_v27, %v2251_v55  ;;  %1566 = vmatpush.msrb.mxu3 %v2094_v49  ;;  %v1778_v49 = vld [vmem:[#allocation4 + $0x130] sm:$0xff] }
 0xc44   :  { %v2173_v58 = vunpack.i.l.bf16 %v2172_v33  ;;  %v2174_v23 = vunpack.i.h.bf16 %v2172_v33  ;;  %v1802_v33 = vld [vmem:[#allocation4 + $0x1f0] sm:$0xff] }
 0xc45   :  { %1567 = vmatpush.msrb.mxu3 %v2093_v52  ;;  %v1777_v52 = vld [vmem:[#allocation4 + $0x128] sm:$0xff] }
 0xc46   :  { %1379 = vmatpush.msrb.mxu2 %v2173_v58  ;;  %v2265_v34 = vpop.eup %2264  ;;  %v1800_v58 = vld [vmem:[#allocation4 + $0x1e0] sm:$0xff] }
 0xc47   :  { %v1506_v63 = vpop.xlane.xlu2 %1505  ;;  %v1509_v35 = vmul.f32 %v2265_v34, %v2253_v61  ;;  %v1792_v34 = vld [vmem:[#allocation4 + $0x1a0] sm:$0xff] }
 0xc48   :  { %1380 = vmatpush.msrb.mxu2 %v2174_v23  ;;  %2266 = vrcp.f32 %v1506_v63  ;;  %v1801_v23 = vld [vmem:[#allocation4 + $0x1e8] sm:$0xff]  ;;  %v1795_v63 = vld [vmem:[#allocation4 + $0x1b8] sm:$0xff] }
 0xc49   :  { %2111 = vmatmul.msk.f32.vlgmr.msrb.gmra.mxu2 %vm287_vm2, %v1349_v24  ;;  %1835 = vmatpush.msra.mxu0 %v1801_v23  ;;  %v1870_v23 = vld [vmem:[#allocation6 + $0x140] sm:$0xff] }
 0xc4b   :  { %v2182_v26 = vpop.permute.xlu1 %2181 }
 0xc4c   :  { %v2183_v28 = vunpack.i.l.bf16 %v2182_v26  ;;  %v2184_v29 = vunpack.i.h.bf16 %v2182_v26 }
 0xc4e   :  { %1668 = vmatpush.msra.mxu1 %v2183_v28  ;;  %v2177_v12 = vpop.permute.xlu0 %2176  ;;  %v2267_v36 = vpop.eup %2266 }
 0xc4f   :  { %v2178_v30 = vunpack.i.l.bf16 %v2177_v12  ;;  %v2179_v32 = vunpack.i.h.bf16 %v2177_v12  ;;  %v1510_v37 = vmul.f32 %v2267_v36, %v2255_v8  ;;  %v1799_v12 = vld [vmem:[#allocation4 + $0x1d8] sm:$0xff]  ;;  %v1790_v36 = vld [vmem:[#allocation4 + $0x190] sm:$0xff] }
 0xc50   :  { %1669 = vmatpush.msra.mxu1 %v2184_v29  ;;  %v1798_v29 = vld [vmem:[#allocation4 + $0x1d0] sm:$0xff]  ;;  %1836 = vmatpush.msra.mxu0 %v1799_v12 }
 0xc51   :  { %2112 = vmatmul.msk.f32.gmra.mxu2 %vm287_vm2, %v1350_v31  ;;  %v1797_v31 = vld [vmem:[#allocation4 + $0x1c8] sm:$0xff] }
 0xc52   :  { %1537 = vmatpush.msra.mxu2 %v2178_v30  ;;  %v1796_v30 = vld [vmem:[#allocation4 + $0x1c0] sm:$0xff]  ;;  %1837 = vmatpush.msra.mxu0 %v1797_v31  ;;  %v1868_v31 = vld [vmem:[#allocation6 + $0x130] sm:$0xff] }
 0xc54   :  { %1538 = vmatpush.msra.mxu2 %v2179_v32  ;;  %v1794_v32 = vld [vmem:[#allocation4 + $0x1b0] sm:$0xff]  ;;  %1838 = vmatpush.msra.mxu0 %v1795_v63  ;;  %v2193_v63 = vld [vmem:[%s2970_s7 + $0x1] ss:$0 sm:$0xff] }
 0xc56   :  { %1695 = vmatpush.msrb.mxu2 %v2100_v53  ;;  %v1774_v53 = vld [vmem:[#allocation4 + $0x110] sm:$0xff] }
 0xc58   :  { %1696 = vmatpush.msrb.mxu2 %v2099_v2  ;;  %v1775_v2 = vld [vmem:[#allocation4 + $0x118] sm:$0xff] }
 0xc59   :  { %2121 = vmatmul.msk.f32.vlgmr.msra.gmra.mxu2 %vm287_vm2, %v1509_v35  ;;  %v1793_v35 = vld [vmem:[#allocation4 + $0x1a8] sm:$0xff] }
 0xc5a   :  { %1697 = vmatpush.msrb.mxu2 %v2098_v4  ;;  %1839 = vmatpush.msra.mxu0 %v1793_v35  ;;  %v1772_v4 = vld [vmem:[#allocation4 + $0x100] sm:$0xff] }
 0xc5c   :  { %1698 = vmatpush.msrb.mxu2 %v2097_v57  ;;  %v1893_v57 = vld [vmem:[#allocation6 + $0x1f8] sm:$0xff] }
 0xc5e   :  { %1922 = vmatpush.msra.mxu2 %v1893_v57 }
 0xc61   :  { %2122 = vmatmul.msk.f32.gmra.mxu2 %vm287_vm2, %v1510_v37  ;;  %v1791_v37 = vld [vmem:[#allocation4 + $0x198] sm:$0xff] }
 0xc62   :  { %1840 = vmatpush.msra.mxu0 %v1791_v37  ;;  %v1882_v37 = vld [vmem:[#allocation6 + $0x1a0] sm:$0xff] }
 0xc64   :  { %1841 = vmatpush.msra.mxu0 %v1789_v1 }
 0xcab   :  { %v1634_v42 = vpop.xlane.xlu2 %1633 }
 0xcac   :  { %2268 = vrcp.f32 %v1634_v42  ;;  %v1787_v42 = vld [vmem:[#allocation4 + $0x178] sm:$0xff] }
 0xcad   :  { %1842 = vmatpush.msra.mxu0 %v1787_v42 }
 0xcb2   :  { %v2269_v44 = vpop.eup %2268 }
 0xcb3   :  { %v1640_v45 = vmul.f32 %v2269_v44, %v2257_v14  ;;  %v1637_v46 = vpop.xlane.xlu2 %1636  ;;  %v1785_v44 = vld [vmem:[#allocation4 + $0x168] sm:$0xff] }
 0xcb4   :  { %2270 = vrcp.f32 %v1637_v46  ;;  %1843 = vmatpush.msra.mxu0 %v1785_v44  ;;  %v1783_v46 = vld [vmem:[#allocation4 + $0x158] sm:$0xff] }
 0xcb5   :  { %2129 = vmatmul.msk.f32.vlgmr.msra.gmra.mxu1 %vm287_vm2, %v1640_v45  ;;  %v1782_v45 = vld [vmem:[#allocation4 + $0x150] sm:$0xff] }
 0xcb6   :  { %1844 = vmatpush.msra.mxu0 %v1783_v46  ;;  %v1867_v46 = vld [vmem:[#allocation6 + $0x128] sm:$0xff] }
 0xcb8   :  { %1845 = vmatpush.msra.mxu0 %v1781_v48  ;;  %v1866_v48 = vld [vmem:[#allocation6 + $0x120] sm:$0xff] }
 0xcba   :  { %v2271_v50 = vpop.eup %2270 }
 0xcbb   :  { %v1641_v51 = vmul.f32 %v2271_v50, %v2259_v18  ;;  %v1779_v50 = vld [vmem:[#allocation4 + $0x138] sm:$0xff] }
 0xcbc   :  { %1846 = vmatpush.msra.mxu0 %v1779_v50  ;;  %v1865_v50 = vld [vmem:[#allocation6 + $0x118] sm:$0xff] }
 0xcbd   :  { %2130 = vmatmul.msk.f32.gmra.mxu1 %vm287_vm2, %v1641_v51  ;;  %v1776_v51 = vld [vmem:[#allocation4 + $0x120] sm:$0xff] }
 0xcbe   :  { %1847 = vmatpush.msra.mxu0 %v1777_v52  ;;  %v1864_v52 = vld [vmem:[#allocation6 + $0x110] sm:$0xff] }
 0xcc0   :  { %1848 = vmatpush.msra.mxu0 %v1775_v2  ;;  %v2136_v2 = vld [vmem:[%s2972_s9 + $0x2] sm:$0x3] }
 0xccc   :  { %v1382_v54 = vpop.f32.mrf.mxu2 }
 0xccd   :  { %2113 = vmatmul.msk.f32.vlgmr.msra.gmra.mxu3 %vm245_vm0, %v1382_v54  ;;  %v1773_v54 = vld [vmem:[#allocation4 + $0x108] sm:$0xff] }
 0xcce   :  { %1811 = vmatpush.msra.mxu3 %v1802_v33  ;;  %1849 = vmatpush.msra.mxu0 %v1773_v54  ;;  %v1871_v33 = vld [vmem:[#allocation6 + $0x148] sm:$0xff] }
 0xcd0   :  { %1812 = vmatpush.msra.mxu3 %v1800_v58 }
 0xcd2   :  { %1813 = vmatpush.msra.mxu3 %v1798_v29  ;;  %v1884_v29 = vld [vmem:[#allocation6 + $0x1b0] sm:$0xff] }
 0xcd4   :  { %v1385_v41 = vpop.f32.mrf.mxu2  ;;  %1814 = vmatpush.msra.mxu3 %v1796_v30 }
 0xcd5   :  { %2114 = vmatmul.msk.f32.gmra.mxu3 %vm245_vm0, %v1385_v41 }
 0xcd6   :  { %1815 = vmatpush.msra.mxu3 %v1794_v32 }
 0xcd8   :  { %1816 = vmatpush.msra.mxu3 %v1792_v34  ;;  %v1883_v34 = vld [vmem:[#allocation6 + $0x1a8] sm:$0xff] }
 0xcda   :  { %1817 = vmatpush.msra.mxu3 %v1790_v36 }
 0xcdc   :  { %v1540_v55 = vpop.f32.mrf.mxu2  ;;  %1818 = vmatpush.msra.mxu3 %v1788_v0 }
 0xcdd   :  { %2123 = vmatmul.msk.f32.vlgmr.msrb.gmra.mxu3 %vm245_vm0, %v1540_v55 }
 0xcde   :  { %1819 = vmatpush.msra.mxu3 %v1786_v40  ;;  %v1881_v40 = vld [vmem:[#allocation6 + $0x198] sm:$0xff] }
 0xce0   :  { %1820 = vmatpush.msra.mxu3 %v1784_v43 }
 0xce2   :  { %1821 = vmatpush.msra.mxu3 %v1782_v45 }
 0xce4   :  { %v1543_v47 = vpop.f32.mrf.mxu2  ;;  %1822 = vmatpush.msra.mxu3 %v1780_v60  ;;  %v1880_v60 = vld [vmem:[#allocation6 + $0x190] sm:$0xff] }
 0xce5   :  { %2124 = vmatmul.msk.f32.gmra.mxu3 %vm245_vm0, %v1543_v47 }
 0xce6   :  { %1823 = vmatpush.msra.mxu3 %v1778_v49  ;;  %v1879_v49 = vld [vmem:[#allocation6 + $0x188] sm:$0xff] }
 0xce8   :  { %1824 = vmatpush.msra.mxu3 %v1776_v51  ;;  %v1878_v51 = vld [vmem:[#allocation6 + $0x180] sm:$0xff] }
 0xcea   :  { %1825 = vmatpush.msra.mxu3 %v1774_v53  ;;  %v1863_v53 = vld [vmem:[#allocation6 + $0x108] sm:$0xff] }
 0xcec   :  { %1826 = vmatpush.msra.mxu3 %v1772_v4  ;;  %v1808_v4 = vperm.slane %v2136_v2, 1 }
 0xd32   :  { %v1671_v59 = vpop.f32.mrf.mxu1 }
 0xd33   :  { %2131 = vmatmul.msk.f32.vlgmr.msrb.gmra.mxu2 %vm245_vm0, %v1671_v59  ;;  %v1892_v59 = vld [vmem:[#allocation6 + $0x1f0] sm:$0xff] }
 0xd34   :  { %1923 = vmatpush.msra.mxu2 %v1892_v59 }
 0xd3a   :  { %v1674_v61 = vpop.f32.mrf.mxu1 }
 0xd3b   :  { %2132 = vmatmul.msk.f32.gmra.mxu2 %vm245_vm0, %v1674_v61  ;;  %v1877_v61 = vld [vmem:[#allocation6 + $0x178] sm:$0xff] }
 0xd3c   :  { %1899 = vmatpush.msrb.mxu1 %v1877_v61 }
 0xd50   :  { %v1411_v62 = vpop.f32.mrf.mxu3 }
 0xd51   :  { %v1441_v5 = vadd.f32 %v2788_v38, %v1411_v62  ;;  %v1876_v62 = vld [vmem:[#allocation6 + $0x170] sm:$0xff] }
 0xd52   :  { %1900 = vmatpush.msrb.mxu1 %v1876_v62 }
 0xd58   :  { %v1414_v3 = vpop.f32.mrf.mxu3 }
 0xd59   :  { %v1444_v15 = vadd.f32 %v2790_v39, %v1414_v3  ;;  %v1891_v3 = vld [vmem:[#allocation6 + $0x1e8] sm:$0xff] }
 0xd5a   :  { %1924 = vmatpush.msra.mxu2 %v1891_v3 }
 0xd60   :  { %v1569_v8 = vpop.f32.mrf.mxu3 }
 0xd61   :  { %v1575_v6 = vadd.f32 %v1569_v8, %v1441_v5  ;;  %v1875_v5 = vld [vmem:[#allocation6 + $0x168] sm:$0xff] }
 0xd62   :  { %1901 = vmatpush.msrb.mxu1 %v1875_v5 }
 0xd68   :  { %v1572_v14 = vpop.f32.mrf.mxu3 }
 0xd69   :  { %v1576_v17 = vadd.f32 %v1572_v14, %v1444_v15  ;;  %v1889_v14 = vld [vmem:[#allocation6 + $0x1d8] sm:$0xff] }
 0xdb6   :  { %v1700_v10 = vpop.f32.mrf.mxu2 }
 0xdb7   :  { %v1706_v11 = vadd.f32 %v1700_v10, %v1575_v6  ;;  %v1874_v10 = vld [vmem:[#allocation6 + $0x160] sm:$0xff] }
 0xdb8   :  { %1902 = vmatpush.msrb.mxu1 %v1874_v10  ;;  %v2194_v10 = vld [vmem:[%s2974_s11 + $0x1] ss:$0 sm:$0xff] }
 0xdb9   :  { %v1713_v13 = vadd.f32 %v2191_v9, %v1706_v11 }
 0xdbb   :  { %v1715_v16 = vadd.f32 %v1713_v13, %v2708_v19 }
 0xdbd   :  { %1721 = vadd.xlane.f32.xlu0 %v1715_v16 }
 0xdbe   :  { %v1703_v18 = vpop.f32.mrf.mxu2 }
 0xdbf   :  { %v1707_v20 = vadd.f32 %v1703_v18, %v1576_v17  ;;  %v1888_v17 = vld [vmem:[#allocation6 + $0x1d0] sm:$0xff] }
 0xdc1   :  { %v1714_v21 = vadd.f32 %v2191_v9, %v1707_v20  ;;  %v1890_v9 = vld [vmem:[#allocation6 + $0x1e0] sm:$0xff]  ;;  %v1872_v20 = vld [vmem:[#allocation6 + $0x150] sm:$0xff] }
 0xdc2   :  { %1925 = vmatpush.msra.mxu2 %v1890_v9 }
 0xdc3   :  { %v1716_v38 = vadd.f32 %v1714_v21, %v2714_v22  ;;  %v1887_v21 = vld [vmem:[#allocation6 + $0x1c8] sm:$0xff] }
 0xdc4   :  { %1926 = vmatpush.msra.mxu2 %v1889_v14 }
 0xdc5   :  { %1723 = vadd.xlane.f32.xlu1 %v1716_v38 }
 0xdc6   :  { %1927 = vmatpush.msra.mxu2 %v1888_v17 }
 0xdc8   :  { %1928 = vmatpush.msra.mxu2 %v1887_v21 }
 0xdca   :  { %1929 = vmatpush.msra.mxu2 %v1886_v7  ;;  %v2015_v7 = vld [vmem:[%s2977_s14 + $0x70] sm:$0xff] }
 0xe30   :  { %v1722_v24 = vpop.xlane.xlu0 %1721 }
 0xe31   :  { %v1725_v39 = vmul.f32 %v1722_v24, %v2661_v56 }
 0xe33   :  { %v2866_v19 = vsub.f32 %v1715_v16, %v1725_v39  ;;  %v1873_v16 = vld [vmem:[#allocation6 + $0x158] sm:$0xff] }
 0xe34   :  { %1903 = vmatpush.msrb.mxu1 %v1873_v16  ;;  %v1885_v39 = vld [vmem:[#allocation6 + $0x1b8] sm:$0xff] }
 0xe35   :  { %v1729_v25 = vmul.f32 %v2866_v19, %v2866_v19  ;;  %1930 = vmatpush.msra.mxu2 %v1885_v39 }
 0xe36   :  { %1904 = vmatpush.msrb.mxu1 %v1872_v20 }
 0xe37   :  { %1731 = vadd.xlane.f32.xlu2 %v1729_v25  ;;  %1931 = vmatpush.msra.mxu2 %v1884_v29  ;;  %v2014_v29 = vld [vmem:[%s2977_s14 + $0x68] sm:$0xff] }
 0xe38   :  { %v1724_v26 = vpop.xlane.xlu1 %1723  ;;  %1905 = vmatpush.msrb.mxu1 %v1871_v33  ;;  %v2016_v33 = vld [vmem:[%s2977_s14 + $0x78] sm:$0xff] }
 0xe39   :  { %v1726_v22 = vmul.f32 %v1724_v26, %v2661_v56  ;;  %1932 = vmatpush.msra.mxu2 %v1883_v34  ;;  %2021 = vmatpush.msrb.mxu3 %v2016_v33  ;;  %v2008_v34 = vld [vmem:[%s2977_s14 + $0x38] sm:$0xff] }
 0xe3a   :  { %1906 = vmatpush.msrb.mxu1 %v1870_v23 }
 0xe3b   :  { %v2871_v27 = vsub.f32 %v1716_v38, %v1726_v22  ;;  %v1869_v22 = vld [vmem:[#allocation6 + $0x138] sm:$0xff]  ;;  %1933 = vmatpush.msra.mxu2 %v1882_v37  ;;  %2022 = vmatpush.msrb.mxu3 %v2015_v7  ;;  %v2005_v37 = vld [vmem:[%s2977_s14 + $0x20] sm:$0xff] }
 0xe3c   :  { %1907 = vmatpush.msrb.mxu1 %v1869_v22 }
 0xe3d   :  { %v1730_v28 = vmul.f32 %v2871_v27, %v2871_v27  ;;  %1934 = vmatpush.msra.mxu2 %v1881_v40  ;;  %2023 = vmatpush.msrb.mxu3 %v2014_v29  ;;  %v2002_v40 = vld [vmem:[%s2977_s14 + $0x8] sm:$0xff] }
 0xe3e   :  { %1908 = vmatpush.msrb.mxu1 %v1868_v31  ;;  %v2011_v31 = vld [vmem:[%s2977_s14 + $0x50] sm:$0xff] }
 0xe3f   :  { %1733 = vadd.xlane.f32.xlu2 %v1730_v28  ;;  %v2192_v28 = vld [vmem:[%s2969_s6 + $0x1] ss:$0 sm:$0xff]  ;;  %1935 = vmatpush.msra.mxu2 %v1880_v60 }
 0xe40   :  { %1909 = vmatpush.msrb.mxu1 %v1867_v46 }
 0xe41   :  { %1936 = vmatpush.msra.mxu2 %v1879_v49 }
 0xe42   :  { %1910 = vmatpush.msrb.mxu1 %v1866_v48 }
 0xe43   :  { %1937 = vmatpush.msra.mxu2 %v1878_v51 }
 0xe44   :  { %1911 = vmatpush.msrb.mxu1 %v1865_v50 }
 0xe46   :  { %1912 = vmatpush.msrb.mxu1 %v1864_v52 }
 0xe48   :  { %1913 = vmatpush.msrb.mxu1 %v1863_v53 }
 0xeaa   :  { %v1732_v41 = vpop.xlane.xlu2 %1731 }
 0xeab   :  { %v1735_v55 = vmul.f32 %v1732_v41, %v2661_v56 }
 0xead   :  { %v1737_v47 = vadd.f32 1e-05, %v1735_v55 }
 0xeaf   :  { %2272 = vrsqrt.f32 %v1737_v47  ;;  %vm1745_vm1 = vweird.f32 %v1737_v47 }
 0xeb2   :  { %v1734_v8 = vpop.xlane.xlu2 %1733 }
 0xeb3   :  { %v1736_v6 = vmul.f32 %v1734_v8, %v2661_v56 }
 0xeb5   :  { %v2273_v11 = vpop.eup %2272  ;;  %v1738_v13 = vadd.f32 1e-05, %v1736_v6 }
 0xeb6   :  { %v1740_v15 = vmul.f32 %v2273_v11, %v1737_v47  ;;  %vm1746_vm0 = vweird.f32 %v2273_v11  ;;  %v1807_v47 = vperm.slane %v2136_v2, 0 }
 0xeb7   :  { %2274 = vrsqrt.f32 %v1738_v13  ;;  %vm1747_vm2 = vmor %vm1745_vm1, %vm1746_vm0  ;;  %vm1755_vm5 = vweird.f32 %v1738_v13 }
 0xeb8   :  { %v1741_v18 = vmul.f32 %v2273_v11, %v1740_v15 }
 0xeba   :  { %v1742_v38 = vmul.f32 0.5, %v1741_v18 }
 0xebc   :  { %v1743_v58 = vsub.f32 1.5, %v1742_v38 }
 0xebd   :  { %v2275_v24 = vpop.eup %2274 }
 0xebe   :  { %v1744_v25 = vmul.f32 %v2273_v11, %v1743_v58  ;;  %v1750_v26 = vmul.f32 %v2275_v24, %v1738_v13  ;;  %vm1756_vm3 = vweird.f32 %v2275_v24 }
 0xebf   :  { %vm1757_vm6 = vmor %vm1755_vm5, %vm1756_vm3 }
 0xec0   :  { %v1748_v12 = vsel %vm1747_vm2, %v2273_v11, %v1744_v25  ;;  %v1751_v30 = vmul.f32 %v2275_v24, %v1750_v26 }
 0xec1   :  { %v1759_v32 = vmul.f32 %v1748_v12, %v2866_v19  ;;  %v2013_v12 = vld [vmem:[%s2977_s14 + $0x60] sm:$0xff] }
 0xec2   :  { %v1752_v35 = vmul.f32 0.5, %v1751_v30  ;;  %2024 = vmatpush.msrb.mxu3 %v2013_v12  ;;  %v2012_v30 = vld [vmem:[%s2977_s14 + $0x58] sm:$0xff] }
 0xec3   :  { %v1764_v36 = vmul.f32 %v2192_v28, %v1759_v32  ;;  %v2010_v32 = vld [vmem:[%s2977_s14 + $0x48] sm:$0xff] }
 0xec4   :  { %v1753_v0 = vsub.f32 1.5, %v1752_v35  ;;  %2025 = vmatpush.msrb.mxu3 %v2012_v30  ;;  %v2007_v35 = vld [vmem:[%s2977_s14 + $0x30] sm:$0xff] }
 0xec5   :  { %v1769_v1 = vadd.f32 %v2193_v63, %v1764_v36  ;;  %v2006_v36 = vld [vmem:[%s2977_s14 + $0x28] sm:$0xff] }
 0xec6   :  { %v1754_v42 = vmul.f32 %v2275_v24, %v1753_v0  ;;  %2026 = vmatpush.msrb.mxu3 %v2011_v31  ;;  %v2004_v0 = vld [vmem:[%s2977_s14 + $0x18] sm:$0xff] }
 0xec7   :  { %1827 = vmatmul.f32.vlgmr.msra.gmra.mxu3 %v1769_v1  ;;  %1850 = vmatmul.f32.vlgmr.msra.gmra.mxu0 %v1769_v1 }
 0xec8   :  { %v1758_v19 = vsel %vm1757_vm6, %v2275_v24, %v1754_v42  ;;  %2027 = vmatpush.msrb.mxu3 %v2010_v32  ;;  %v2001_v42 = vld [vmem:[%s2977_s14] sm:$0xff] }
 0xec9   :  { %v1760_v43 = vmul.f32 %v1758_v19, %v2871_v27  ;;  %v1862_v27 = vld [vmem:[#allocation6 + $0x100] sm:$0xff] }
 0xeca   :  { %1914 = vmatpush.msrb.mxu1 %v1862_v27 }
 0xecb   :  { %v1765_v44 = vmul.f32 %v2192_v28, %v1760_v43 }
 0xecd   :  { %v1770_v45 = vadd.f32 %v2193_v63, %v1765_v44  ;;  %v2009_v63 = vld [vmem:[%s2977_s14 + $0x40] sm:$0xff] }
 0xece   :  { %2028 = vmatpush.msrb.mxu3 %v2009_v63 }
 0xecf   :  { %1830 = vmatmul.f32.gmra.mxu3 %v1770_v45  ;;  %1853 = vmatmul.f32.gmra.mxu0 %v1770_v45 }
 0xed0   :  { %2029 = vmatpush.msrb.mxu3 %v2008_v34 }
 0xed2   :  { %2030 = vmatpush.msrb.mxu3 %v2007_v35 }
 0xed4   :  { %2031 = vmatpush.msrb.mxu3 %v2006_v36 }
 0xed6   :  { %2032 = vmatpush.msrb.mxu3 %v2005_v37 }
 0xed8   :  { %2033 = vmatpush.msrb.mxu3 %v2004_v0 }
 0xf44   :  { %v1851_v54 = vpop.f32.mrf.mxu0 }
 0xf45   :  { %v1852_v41 = vadd.f32 %v1851_v54, %v1808_v4 }
 0xf47   :  { %v1858_v55 = vmax.f32 %v1852_v41, 0.0 }
 0xf49   :  { %1938 = vmatmul.f32.vlgmr.msra.gmra.mxu2 %v1858_v55  ;;  %v2196_v55 = vld [vmem:[%s2976_s13 + $0x1] ss:$0 sm:$0xff] }
 0xf4a   :  { %v1828_v57 = vpop.f32.mrf.mxu3 }
 0xf4b   :  { %v1829_v59 = vadd.f32 %v1828_v57, %v1807_v47 }
 0xf4c   :  { %v1854_v61 = vpop.f32.mrf.mxu0 }
 0xf4d   :  { %v1857_v62 = vmax.f32 %v1829_v59, 0.0  ;;  %v1855_v3 = vadd.f32 %v1854_v61, %v1808_v4  ;;  %v2195_v4 = vld [vmem:[%s2975_s12 + $0x1] ss:$0 sm:$0xff] }
 0xf4f   :  { %v1860_v8 = vmax.f32 %v1855_v3, 0.0  ;;  %1915 = vmatmul.f32.vlgmr.msrb.gmra.mxu1 %v1857_v62 }
 0xf51   :  { %1941 = vmatmul.f32.gmra.mxu2 %v1860_v8 }
 0xf52   :  { %v1831_v5 = vpop.f32.mrf.mxu3 }
 0xf53   :  { %v1832_v6 = vadd.f32 %v1831_v5, %v1807_v47 }
 0xf55   :  { %v1859_v9 = vmax.f32 %v1832_v6, 0.0 }
 0xf57   :  { %1918 = vmatmul.f32.gmra.mxu1 %v1859_v9  ;;  %v2197_v9 = vld [vmem:[%s2978_s15] ss:$0 sm:$0xff] }
 0xfcc   :  { %v1916_v11 = vpop.f32.mrf.mxu1  ;;  %v1939_v13 = vpop.f32.mrf.mxu2 }
 0xfcd   :  { %v1917_v14 = vadd.f32 %v2194_v10, %v1916_v11 }
 0xfcf   :  { %v1940_v15 = vadd.f32 %v1939_v13, %v1917_v14 }
 0xfd1   :  { %v1945_v16 = vadd.f32 %v1940_v15, %v1769_v1  ;;  %v2003_v1 = vld [vmem:[%s2977_s14 + $0x10] sm:$0xff] }
 0xfd2   :  { %2034 = vmatpush.msrb.mxu3 %v2003_v1 }
 0xfd3   :  { %1951 = vadd.xlane.f32.xlu2 %v1945_v16 }
 0xfd4   :  { %v1919_v17 = vpop.f32.mrf.mxu1  ;;  %v1942_v20 = vpop.f32.mrf.mxu2  ;;  %2035 = vmatpush.msrb.mxu3 %v2002_v40 }
 0xfd5   :  { %v1920_v18 = vadd.f32 %v2194_v10, %v1919_v17 }
 0xfd6   :  { %2036 = vmatpush.msrb.mxu3 %v2001_v42 }
 0xfd7   :  { %v1943_v21 = vadd.f32 %v1942_v20, %v1920_v18 }
 0xfd9   :  { %v1946_v38 = vadd.f32 %v1943_v21, %v1770_v45 }
 0xfdb   :  { %1953 = vadd.xlane.f32.xlu2 %v1946_v38 }
0x1046   :  { %v1952_v58 = vpop.xlane.xlu2 %1951 }
0x1047   :  { %v1955_v23 = vmul.f32 %v1952_v58, %v2661_v56 }
0x1049   :  { %v1957_v24 = vsub.f32 %v1945_v16, %v1955_v23 }
0x104b   :  { %v1959_v39 = vmul.f32 %v1957_v24, %v1957_v24 }
0x104d   :  { %1961 = vadd.xlane.f32.xlu2 %v1959_v39 }
0x104e   :  { %v1954_v25 = vpop.xlane.xlu2 %1953 }
0x104f   :  { %v1956_v26 = vmul.f32 %v1954_v25, %v2661_v56 }
0x1051   :  { %v2899_v22 = vsub.f32 %v1946_v38, %v1956_v26 }
0x1053   :  { %v1960_v28 = vmul.f32 %v2899_v22, %v2899_v22 }
0x1055   :  { %1963 = vadd.xlane.f32.xlu0 %v1960_v28 }
0x10c0   :  { %v1962_v19 = vpop.xlane.xlu2 %1961 }
0x10c1   :  { %v1965_v43 = vmul.f32 %v1962_v19, %v2661_v56 }
0x10c3   :  { %v1967_v44 = vadd.f32 1e-05, %v1965_v43 }
0x10c5   :  { %2276 = vrsqrt.f32 %v1967_v44  ;;  %vm1975_vm8 = vweird.f32 %v1967_v44 }
0x10c8   :  { %v1964_v45 = vpop.xlane.xlu0 %1963 }
0x10c9   :  { %v1966_v46 = vmul.f32 %v1964_v45, %v2661_v56 }
0x10cb   :  { %v2277_v60 = vpop.eup %2276  ;;  %v1968_v48 = vadd.f32 1e-05, %v1966_v46 }
0x10cc   :  { %v1970_v49 = vmul.f32 %v2277_v60, %v1967_v44  ;;  %vm1976_vm7 = vweird.f32 %v2277_v60 }
0x10cd   :  { %2278 = vrsqrt.f32 %v1968_v48  ;;  %vm1977_vm9 = vmor %vm1975_vm8, %vm1976_vm7  ;;  %vm1985_vm11 = vweird.f32 %v1968_v48 }
0x10ce   :  { %v1971_v50 = vmul.f32 %v2277_v60, %v1970_v49 }
0x10d0   :  { %v1972_v51 = vmul.f32 0.5, %v1971_v50 }
0x10d2   :  { %v1973_v52 = vsub.f32 1.5, %v1972_v51 }
0x10d3   :  { %v2279_v53 = vpop.eup %2278 }
0x10d4   :  { %v1974_v27 = vmul.f32 %v2277_v60, %v1973_v52  ;;  %v1980_v2 = vmul.f32 %v2279_v53, %v1968_v48  ;;  %vm1986_vm10 = vweird.f32 %v2279_v53 }
0x10d5   :  { %vm1987_vm12 = vmor %vm1985_vm11, %vm1986_vm10 }
0x10d6   :  { %v1978_v54 = vsel %vm1977_vm9, %v2277_v60, %v1974_v27  ;;  %v1981_v41 = vmul.f32 %v2279_v53, %v1980_v2 }
0x10d7   :  { %v1989_v56 = vmul.f32 %v1978_v54, %v1957_v24 }
0x10d8   :  { %v1982_v47 = vmul.f32 0.5, %v1981_v41 }
0x10d9   :  { %v1994_v57 = vmul.f32 %v2195_v4, %v1989_v56 }
0x10da   :  { %v1983_v59 = vsub.f32 1.5, %v1982_v47 }
0x10db   :  { %v1999_v61 = vadd.f32 %v2196_v55, %v1994_v57 }
0x10dc   :  { %v1984_v62 = vmul.f32 %v2279_v53, %v1983_v59 }
0x10dd   :  { %2037 = vmatmul.f32.vlgmr.msrb.gmra.mxu3 %v1999_v61 }
0x10de   :  { %v1988_v3 = vsel %vm1987_vm12, %v2279_v53, %v1984_v62 }
0x10df   :  { %v1990_v8 = vmul.f32 %v1988_v3, %v2899_v22 }
0x10e1   :  { %v1995_v5 = vmul.f32 %v2195_v4, %v1990_v8 }
0x10e3   :  { %v2000_v6 = vadd.f32 %v2196_v55, %v1995_v5 }
0x10e5   :  { %2040 = vmatmul.f32.gmra.mxu3 %v2000_v6 }
0x1160   :  { %v2038_v10 = vpop.f32.mrf.mxu3 }
0x1161   :  { %v2039_v11 = vadd.f32 %v2197_v9, %v2038_v10 }
0x1163   :  { %2044 = vst [vmem:[%s2979_s16] sm:$0xff] %v2039_v11 }
0x1168   :  { %v2041_v13 = vpop.f32.mrf.mxu3 }
0x1169   :  { %v2042_v14 = vadd.f32 %v2197_v9, %v2041_v13 }
0x116b   :  { %2045 = vst [vmem:[%s2979_s16 + $0x8] sm:$0xff] %v2042_v14 }
0x116c   :  { %2050 = vsyncpa [#allocation3], 1 }
0x116d   :  { %2051 = vsyncpa [#allocation5], 1 }

</bundles_post_ra>
